<compile_context>
chip_gen: v7x
topology: tpu7x:2x2x1
jax: 0.10.0
libtpu: 0.0.40
codegen_flags: <defaults>
</compile_context>

<pallas_src>
import jax
import jax.numpy as jnp
from jax import lax
from jax.experimental import pallas as pl
from jax.experimental.pallas import tpu as pltpu

_EPS = 1e-5
_INV_SQRT2 = 0.7071067811865476


def _gelu(x):
    # exact GELU (matches torch.nn.GELU default, erf-based)
    return 0.5 * x * (1.0 + lax.erf(x * _INV_SQRT2))


def _make_kernel(NB, H, WC, K):
    """Kernel processing NB images (NB*H rows) per grid step."""
    p = (K - 1) // 2
    R = NB * H

    def kernel(x_ref, band1_ref, band2_ref, bd_ref, aux_ref, o_ref):
        # x_ref    : (NB, H, WC)  lane-dense activations, lane = w*C + c
        # band*_ref: (K, WC, WC)  banded depthwise weights (one per H-offset),
        #                         W-boundary mask and BN scale folded in
        # bd_ref   : (WC, WC)     block-diagonal pointwise (1x1 conv) weight
        # aux_ref  : (8, WC)      rows: t1, t2, pw_bias, s3, t3, 0, 0, 0
        x = x_ref[...].reshape(R, WC).astype(jnp.float32)        # (R, WC)
        # per-image row index -> H-padding mask that also prevents any
        # cross-image bleed from the sublane roll when NB > 1
        rowmod = lax.broadcasted_iota(jnp.int32, (NB, H, 1), 1).reshape(R, 1)

        def dwconv(v, band_ref):
            acc = jnp.zeros((R, WC), jnp.float32)
            for di in range(K):
                dh = di - p
                if dh == 0:
                    vh = v
                else:
                    # sublane roll so that vh[r] = v[r + dh]; zero rows whose
                    # in-image source row would be outside [0, H)
                    vh = pltpu.roll(v, (-dh) % R, axis=0)
                    keep = (rowmod + dh >= 0) & (rowmod + dh < H)
                    vh = jnp.where(keep, vh, 0.0)
                # all W-direction taps of this H-offset in one MXU matmul
                acc = acc + jnp.dot(vh, band_ref[di],
                                    preferred_element_type=jnp.float32)
            return acc

        t1 = aux_ref[0:1, :]
        t2 = aux_ref[1:2, :]
        pb = aux_ref[2:3, :]
        s3 = aux_ref[3:4, :]
        t3 = aux_ref[4:5, :]

        # depthwise conv #1 (+ folded BN scale) -> shift -> GELU
        y = _gelu(dwconv(x, band1_ref) + t1)
        # depthwise conv #2 (+ folded BN scale) -> shift -> GELU
        y = _gelu(dwconv(y, band2_ref) + t2)
        # residual
        z = y + x
        # pointwise 1x1 conv as one full-lane MXU matmul, + bias, GELU, BN
        pw = jnp.dot(z, bd_ref[...], preferred_element_type=jnp.float32) + pb
        out = _gelu(pw) * s3 + t3
        o_ref[...] = out.reshape(NB, H, WC).astype(o_ref.dtype)

    return kernel


def _fold_bn(g, b, m, v):
    s = g / jnp.sqrt(v + _EPS)
    return s, b - m * s


def _lane(vec_c, W):
    # (C,) -> (W*C,) tiled per pixel
    return jnp.tile(vec_c.astype(jnp.float32), W)


def _make_bands(w_c1kk, scale_c, W, K, C):
    """Depthwise weights (C,1,K,K) -> K banded (WC, WC) matrices.

    band[di][w_in*C + c_in, w_out*C + c_out] =
        (c_in == c_out) * weight[c_out, di, w_in - w_out + p] * scale[c_out]
    for valid tap offsets; the W zero-padding boundary is implicit (w_in is
    restricted to [0, W)).  The per-channel BN scale is folded into columns.
    """
    f32 = jnp.float32
    p = (K - 1) // 2
    wt = jnp.transpose(w_c1kk[:, 0], (1, 2, 0)).astype(f32)          # (K, K, C): [di, dj, c]
    w_in = jnp.arange(W)
    w_out = jnp.arange(W)
    dj = w_in[:, None] - w_out[None, :] + p                          # (W, W)
    valid = ((dj >= 0) & (dj < K)).astype(f32)
    dj_c = jnp.clip(dj, 0, K - 1)
    tapw = wt[:, dj_c, :] * valid[None, :, :, None]                  # (K, W, W, C)
    eye_c = jnp.eye(C, dtype=f32)
    band = tapw[:, :, None, :, :] * eye_c[None, None, :, None, :]    # (K, W, C, W, C)
    band = band * scale_c.astype(f32)[None, None, None, None, :]
    return band.reshape(K, W * C, W * C)


def _use_batch_parallel_grid():
    # Keep a parallel batch grid only on v7x (2 TensorCores/chip); on
    # single-TC v5e/v6e fuse the batch into one grid step instead.
    try:
        kind = jax.devices()[0].device_kind.lower()
    except Exception:
        return False
    return "v7" in kind


def convmixer_block(x_nchw, params, kernel_size):
    N, C, H, W = x_nchw.shape
    K = kernel_size
    WC = W * C
    f32 = jnp.float32

    # glue: NCHW -> lane-dense (N, H, W*C), lane index = w*C + c
    x = jnp.transpose(x_nchw, (0, 2, 3, 1)).reshape(N, H, WC)

    s1, t1 = _fold_bn(params['bn1_g'], params['bn1_b'], params['bn1_m'], params['bn1_v'])
    s2, t2 = _fold_bn(params['bn2_g'], params['bn2_b'], params['bn2_m'], params['bn2_v'])
    s3, t3 = _fold_bn(params['bn3_g'], params['bn3_b'], params['bn3_m'], params['bn3_v'])
    # fold depthwise conv bias into the BN shift: BN(conv + b) = conv*s + (t + b*s)
    t1 = t1 + params['dw1_b'] * s1
    t2 = t2 + params['dw2_b'] * s2

    # banded depthwise weights with BN scale folded into the columns
    band1 = _make_bands(params['dw1_w'], s1, W, K, C)
    band2 = _make_bands(params['dw2_w'], s2, W, K, C)

    # pointwise weight (Cout,Cin,1,1) -> (Cin,Cout) -> block-diagonal (WC,WC)
    pw_cc = jnp.transpose(params['pw_w'][:, :, 0, 0], (1, 0)).astype(f32)
    bd = jnp.kron(jnp.eye(W, dtype=f32), pw_cc)

    aux = jnp.stack([_lane(t1, W), _lane(t2, W), _lane(params['pw_b'], W),
                     _lane(s3, W), _lane(t3, W),
                     jnp.zeros((WC,), f32), jnp.zeros((WC,), f32),
                     jnp.zeros((WC,), f32)])                          # (8, WC)

    if _use_batch_parallel_grid() and N > 1:
        nb, grid, dims = 1, (N,), ("parallel",)
        x_map = lambda n: (n, 0, 0)
    else:
        nb, grid, dims = N, (1,), ("arbitrary",)
        x_map = lambda n: (0, 0, 0)

    kernel = _make_kernel(nb, H, WC, K)

    out = pl.pallas_call(
        kernel,
        out_shape=jax.ShapeDtypeStruct((N, H, WC), x_nchw.dtype),
        grid_spec=pltpu.PrefetchScalarGridSpec(
            num_scalar_prefetch=0,
            grid=grid,
            in_specs=[
                pl.BlockSpec((nb, H, WC), x_map),
                pl.BlockSpec((K, WC, WC), lambda n: (0, 0, 0)),
                pl.BlockSpec((K, WC, WC), lambda n: (0, 0, 0)),
                pl.BlockSpec((WC, WC), lambda n: (0, 0)),
                pl.BlockSpec((8, WC), lambda n: (0, 0)),
            ],
            out_specs=pl.BlockSpec((nb, H, WC), x_map),
        ),
        compiler_params=pltpu.CompilerParams(dimension_semantics=dims),
    )(x, band1, band2, bd, aux)

    # lane-dense (N, H, W*C) -> NCHW
    return jnp.transpose(out.reshape(N, H, W, C), (0, 3, 1, 2))


def ref_convmixer(x, params, K):
    """Pure-JAX reference mimicking the PyTorch module (eval-mode BN)."""
    C = x.shape[1]
    dn = ('NCHW', 'OIHW', 'NCHW')

    def dwconv(x, w, b):
        y = lax.conv_general_dilated(x, w, (1, 1), 'SAME',
                                     dimension_numbers=dn, feature_group_count=C)
        return y + b.reshape(1, C, 1, 1)

    def bn(x, g, bt, m, v):
        return ((x - m.reshape(1, C, 1, 1)) / jnp.sqrt(v.reshape(1, C, 1, 1) + _EPS)
                * g.reshape(1, C, 1, 1) + bt.reshape(1, C, 1, 1))

    y = _gelu(bn(dwconv(x, params['dw1_w'], params['dw1_b']),
                 params['bn1_g'], params['bn1_b'], params['bn1_m'], params['bn1_v']))
    y = _gelu(bn(dwconv(y, params['dw2_w'], params['dw2_b']),
                 params['bn2_g'], params['bn2_b'], params['bn2_m'], params['bn2_v']))
    y = y + x
    z = lax.conv_general_dilated(y, params['pw_w'], (1, 1), 'SAME', dimension_numbers=dn)
    z = z + params['pw_b'].reshape(1, C, 1, 1)
    z = _gelu(z)
    return bn(z, params['bn3_g'], params['bn3_b'], params['bn3_m'], params['bn3_v'])


if __name__ == "__main__":
    N, C, H, W, K = 2, 8, 16, 16, 5   # dim=8, kernel_size=5 -> W*C = 128 lanes

    key = jax.random.PRNGKey(0)
    ks = jax.random.split(key, 21)
    f32 = jnp.float32
    params = {
        'dw1_w': 0.1 * jax.random.normal(ks[0], (C, 1, K, K), f32),
        'dw1_b': 0.1 * jax.random.normal(ks[1], (C,), f32),
        'bn1_g': 1.0 + 0.1 * jax.random.normal(ks[2], (C,), f32),
        'bn1_b': 0.1 * jax.random.normal(ks[3], (C,), f32),
        'bn1_m': 0.1 * jax.random.normal(ks[4], (C,), f32),
        'bn1_v': 0.5 + jnp.abs(jax.random.normal(ks[5], (C,), f32)),
        'dw2_w': 0.1 * jax.random.normal(ks[6], (C, 1, K, K), f32),
        'dw2_b': 0.1 * jax.random.normal(ks[7], (C,), f32),
        'bn2_g': 1.0 + 0.1 * jax.random.normal(ks[8], (C,), f32),
        'bn2_b': 0.1 * jax.random.normal(ks[9], (C,), f32),
        'bn2_m': 0.1 * jax.random.normal(ks[10], (C,), f32),
        'bn2_v': 0.5 + jnp.abs(jax.random.normal(ks[11], (C,), f32)),
        'pw_w': 0.1 * jax.random.normal(ks[12], (C, C, 1, 1), f32),
        'pw_b': 0.1 * jax.random.normal(ks[13], (C,), f32),
        'bn3_g': 1.0 + 0.1 * jax.random.normal(ks[14], (C,), f32),
        'bn3_b': 0.1 * jax.random.normal(ks[15], (C,), f32),
        'bn3_m': 0.1 * jax.random.normal(ks[16], (C,), f32),
        'bn3_v': 0.5 + jnp.abs(jax.random.normal(ks[17], (C,), f32)),
    }
    x = jax.random.normal(ks[20], (N, C, H, W), f32)

    out = convmixer_block(x, params, K)
    out = jax.block_until_ready(out)

    ref = ref_convmixer(x, params, K)
    max_err = float(jnp.max(jnp.abs(out - ref)))
    assert out.shape == (N, C, H, W)
    assert jnp.allclose(out, ref, atol=1e-4, rtol=1e-4), f"max_err={max_err}"

    print("KERNEL_OK")
</pallas_src>

<mosaic_0001>
module attributes {stable_mosaic.version = 11 : i64} {
  func.func @kernel(%arg0: i32, %arg1: memref<2x16x128xf32, #tpu.memory_space<vmem>>, %arg2: memref<5x128x128xf32, #tpu.memory_space<vmem>>, %arg3: memref<5x128x128xf32, #tpu.memory_space<vmem>>, %arg4: memref<128x128xf32, #tpu.memory_space<vmem>>, %arg5: memref<8x128xf32, #tpu.memory_space<vmem>>, %arg6: memref<2x16x128xf32, #tpu.memory_space<vmem>>) attributes {dimension_semantics = [#tpu.dimension_semantics<arbitrary>], iteration_bounds = array<i64: 1>, scalar_prefetch = 0 : i64, scratch_operands = 0 : i64, tpu.core_type = #tpu.core_type<tc>, window_params = [{pipeline_mode = #tpu.pipeline_mode<synchronous>, transform_indices = @transform_0, window_bounds = array<i64: 2, 16, 128>}, {pipeline_mode = #tpu.pipeline_mode<synchronous>, transform_indices = @transform_1, window_bounds = array<i64: 5, 128, 128>}, {pipeline_mode = #tpu.pipeline_mode<synchronous>, transform_indices = @transform_2, window_bounds = array<i64: 5, 128, 128>}, {pipeline_mode = #tpu.pipeline_mode<synchronous>, transform_indices = @transform_3, window_bounds = array<i64: 128, 128>}, {pipeline_mode = #tpu.pipeline_mode<synchronous>, transform_indices = @transform_4, window_bounds = array<i64: 8, 128>}, {pipeline_mode = #tpu.pipeline_mode<synchronous>, transform_indices = @transform_5, window_bounds = array<i64: 2, 16, 128>}]} {
    %c0 = arith.constant 0 : index
    %c0_0 = arith.constant 0 : index
    %c0_1 = arith.constant 0 : index
    %0 = vector.load %arg1[%c0, %c0_0, %c0_1] : memref<2x16x128xf32, #tpu.memory_space<vmem>>, vector<2x16x128xf32>
    %1 = vector.shape_cast %0 : vector<2x16x128xf32> to vector<32x128xf32>
    %2 = tpu.iota {dimensions = array<i32: 1>} : vector<2x16x1xi32>
    %3 = vector.shape_cast %2 : vector<2x16x1xi32> to vector<32x1xi32>
    %c0_2 = arith.constant 0 : index
    %c0_3 = arith.constant 0 : index
    %4 = vector.load %arg5[%c0_2, %c0_3] : memref<8x128xf32, #tpu.memory_space<vmem>>, vector<1x128xf32>
    %c1 = arith.constant 1 : index
    %c0_4 = arith.constant 0 : index
    %5 = vector.load %arg5[%c1, %c0_4] : memref<8x128xf32, #tpu.memory_space<vmem>>, vector<1x128xf32>
    %c2 = arith.constant 2 : index
    %c0_5 = arith.constant 0 : index
    %6 = vector.load %arg5[%c2, %c0_5] : memref<8x128xf32, #tpu.memory_space<vmem>>, vector<1x128xf32>
    %c3 = arith.constant 3 : index
    %c0_6 = arith.constant 0 : index
    %7 = vector.load %arg5[%c3, %c0_6] : memref<8x128xf32, #tpu.memory_space<vmem>>, vector<1x128xf32>
    %c4 = arith.constant 4 : index
    %c0_7 = arith.constant 0 : index
    %8 = vector.load %arg5[%c4, %c0_7] : memref<8x128xf32, #tpu.memory_space<vmem>>, vector<1x128xf32>
    %cst = arith.constant 0.000000e+00 : f32
    %9 = vector.broadcast %cst : f32 to vector<32x128xf32>
    %c2_i32 = arith.constant 2 : i32
    %10 = tpu.dynamic_rotate %1 by %c2_i32 dim 0 : vector<32x128xf32>, i32 -> vector<32x128xf32>
    %c-2_i32 = arith.constant -2 : i32
    %11 = vector.broadcast %c-2_i32 : i32 to vector<32x1xi32>
    %12 = arith.addi %3, %11 : vector<32x1xi32>
    %c0_i32 = arith.constant 0 : i32
    %13 = vector.broadcast %c0_i32 : i32 to vector<32x1xi32>
    %14 = arith.cmpi sge, %12, %13 : vector<32x1xi32>
    %c-2_i32_8 = arith.constant -2 : i32
    %15 = vector.broadcast %c-2_i32_8 : i32 to vector<32x1xi32>
    %16 = arith.addi %3, %15 : vector<32x1xi32>
    %c16_i32 = arith.constant 16 : i32
    %17 = vector.broadcast %c16_i32 : i32 to vector<32x1xi32>
    %18 = arith.cmpi slt, %16, %17 : vector<32x1xi32>
    %19 = arith.andi %14, %18 : vector<32x1xi1>
    %cst_9 = arith.constant 0.000000e+00 : f32
    %20 = vector.shape_cast %19 : vector<32x1xi1> to vector<32x1xi1>
    %21 = vector.broadcast %20 : vector<32x1xi1> to vector<32x128xi1>
    %22 = vector.broadcast %cst_9 : f32 to vector<32x128xf32>
    %23 = arith.select %21, %10, %22 : vector<32x128xi1>, vector<32x128xf32>
    %c0_10 = arith.constant 0 : index
    %c0_11 = arith.constant 0 : index
    %c0_12 = arith.constant 0 : index
    %24 = vector.load %arg2[%c0_10, %c0_11, %c0_12] : memref<5x128x128xf32, #tpu.memory_space<vmem>>, vector<1x128x128xf32>
    %25 = vector.shape_cast %24 : vector<1x128x128xf32> to vector<128x128xf32>
    %cst_13 = arith.constant dense<0.000000e+00> : vector<32x128xf32>
    %26 = tpu.matmul %23, %25, %cst_13 {dimension_numbers = #tpu.dot_dimension_numbers<[1], [0], [0], [1], [0, 0, 1, 1], [], []>} : vector<32x128xf32>, vector<128x128xf32>, vector<32x128xf32> -> vector<32x128xf32>
    %27 = arith.addf %9, %26 : vector<32x128xf32>
    %c1_i32 = arith.constant 1 : i32
    %28 = tpu.dynamic_rotate %1 by %c1_i32 dim 0 : vector<32x128xf32>, i32 -> vector<32x128xf32>
    %c-1_i32 = arith.constant -1 : i32
    %29 = vector.broadcast %c-1_i32 : i32 to vector<32x1xi32>
    %30 = arith.addi %3, %29 : vector<32x1xi32>
    %c0_i32_14 = arith.constant 0 : i32
    %31 = vector.broadcast %c0_i32_14 : i32 to vector<32x1xi32>
    %32 = arith.cmpi sge, %30, %31 : vector<32x1xi32>
    %c-1_i32_15 = arith.constant -1 : i32
    %33 = vector.broadcast %c-1_i32_15 : i32 to vector<32x1xi32>
    %34 = arith.addi %3, %33 : vector<32x1xi32>
    %c16_i32_16 = arith.constant 16 : i32
    %35 = vector.broadcast %c16_i32_16 : i32 to vector<32x1xi32>
    %36 = arith.cmpi slt, %34, %35 : vector<32x1xi32>
    %37 = arith.andi %32, %36 : vector<32x1xi1>
    %cst_17 = arith.constant 0.000000e+00 : f32
    %38 = vector.shape_cast %37 : vector<32x1xi1> to vector<32x1xi1>
    %39 = vector.broadcast %38 : vector<32x1xi1> to vector<32x128xi1>
    %40 = vector.broadcast %cst_17 : f32 to vector<32x128xf32>
    %41 = arith.select %39, %28, %40 : vector<32x128xi1>, vector<32x128xf32>
    %c1_18 = arith.constant 1 : index
    %c0_19 = arith.constant 0 : index
    %c0_20 = arith.constant 0 : index
    %42 = vector.load %arg2[%c1_18, %c0_19, %c0_20] : memref<5x128x128xf32, #tpu.memory_space<vmem>>, vector<1x128x128xf32>
    %43 = vector.shape_cast %42 : vector<1x128x128xf32> to vector<128x128xf32>
    %cst_21 = arith.constant dense<0.000000e+00> : vector<32x128xf32>
    %44 = tpu.matmul %41, %43, %cst_21 {dimension_numbers = #tpu.dot_dimension_numbers<[1], [0], [0], [1], [0, 0, 1, 1], [], []>} : vector<32x128xf32>, vector<128x128xf32>, vector<32x128xf32> -> vector<32x128xf32>
    %45 = arith.addf %27, %44 : vector<32x128xf32>
    %c2_22 = arith.constant 2 : index
    %c0_23 = arith.constant 0 : index
    %c0_24 = arith.constant 0 : index
    %46 = vector.load %arg2[%c2_22, %c0_23, %c0_24] : memref<5x128x128xf32, #tpu.memory_space<vmem>>, vector<1x128x128xf32>
    %47 = vector.shape_cast %46 : vector<1x128x128xf32> to vector<128x128xf32>
    %cst_25 = arith.constant dense<0.000000e+00> : vector<32x128xf32>
    %48 = tpu.matmul %1, %47, %cst_25 {dimension_numbers = #tpu.dot_dimension_numbers<[1], [0], [0], [1], [0, 0, 1, 1], [], []>} : vector<32x128xf32>, vector<128x128xf32>, vector<32x128xf32> -> vector<32x128xf32>
    %49 = arith.addf %45, %48 : vector<32x128xf32>
    %c31_i32 = arith.constant 31 : i32
    %50 = tpu.dynamic_rotate %1 by %c31_i32 dim 0 : vector<32x128xf32>, i32 -> vector<32x128xf32>
    %c1_i32_26 = arith.constant 1 : i32
    %51 = vector.broadcast %c1_i32_26 : i32 to vector<32x1xi32>
    %52 = arith.addi %3, %51 : vector<32x1xi32>
    %c0_i32_27 = arith.constant 0 : i32
    %53 = vector.broadcast %c0_i32_27 : i32 to vector<32x1xi32>
    %54 = arith.cmpi sge, %52, %53 : vector<32x1xi32>
    %c1_i32_28 = arith.constant 1 : i32
    %55 = vector.broadcast %c1_i32_28 : i32 to vector<32x1xi32>
    %56 = arith.addi %3, %55 : vector<32x1xi32>
    %c16_i32_29 = arith.constant 16 : i32
    %57 = vector.broadcast %c16_i32_29 : i32 to vector<32x1xi32>
    %58 = arith.cmpi slt, %56, %57 : vector<32x1xi32>
    %59 = arith.andi %54, %58 : vector<32x1xi1>
    %cst_30 = arith.constant 0.000000e+00 : f32
    %60 = vector.shape_cast %59 : vector<32x1xi1> to vector<32x1xi1>
    %61 = vector.broadcast %60 : vector<32x1xi1> to vector<32x128xi1>
    %62 = vector.broadcast %cst_30 : f32 to vector<32x128xf32>
    %63 = arith.select %61, %50, %62 : vector<32x128xi1>, vector<32x128xf32>
    %c3_31 = arith.constant 3 : index
    %c0_32 = arith.constant 0 : index
    %c0_33 = arith.constant 0 : index
    %64 = vector.load %arg2[%c3_31, %c0_32, %c0_33] : memref<5x128x128xf32, #tpu.memory_space<vmem>>, vector<1x128x128xf32>
    %65 = vector.shape_cast %64 : vector<1x128x128xf32> to vector<128x128xf32>
    %cst_34 = arith.constant dense<0.000000e+00> : vector<32x128xf32>
    %66 = tpu.matmul %63, %65, %cst_34 {dimension_numbers = #tpu.dot_dimension_numbers<[1], [0], [0], [1], [0, 0, 1, 1], [], []>} : vector<32x128xf32>, vector<128x128xf32>, vector<32x128xf32> -> vector<32x128xf32>
    %67 = arith.addf %49, %66 : vector<32x128xf32>
    %c30_i32 = arith.constant 30 : i32
    %68 = tpu.dynamic_rotate %1 by %c30_i32 dim 0 : vector<32x128xf32>, i32 -> vector<32x128xf32>
    %c2_i32_35 = arith.constant 2 : i32
    %69 = vector.broadcast %c2_i32_35 : i32 to vector<32x1xi32>
    %70 = arith.addi %3, %69 : vector<32x1xi32>
    %c0_i32_36 = arith.constant 0 : i32
    %71 = vector.broadcast %c0_i32_36 : i32 to vector<32x1xi32>
    %72 = arith.cmpi sge, %70, %71 : vector<32x1xi32>
    %c2_i32_37 = arith.constant 2 : i32
    %73 = vector.broadcast %c2_i32_37 : i32 to vector<32x1xi32>
    %74 = arith.addi %3, %73 : vector<32x1xi32>
    %c16_i32_38 = arith.constant 16 : i32
    %75 = vector.broadcast %c16_i32_38 : i32 to vector<32x1xi32>
    %76 = arith.cmpi slt, %74, %75 : vector<32x1xi32>
    %77 = arith.andi %72, %76 : vector<32x1xi1>
    %cst_39 = arith.constant 0.000000e+00 : f32
    %78 = vector.shape_cast %77 : vector<32x1xi1> to vector<32x1xi1>
    %79 = vector.broadcast %78 : vector<32x1xi1> to vector<32x128xi1>
    %80 = vector.broadcast %cst_39 : f32 to vector<32x128xf32>
    %81 = arith.select %79, %68, %80 : vector<32x128xi1>, vector<32x128xf32>
    %c4_40 = arith.constant 4 : index
    %c0_41 = arith.constant 0 : index
    %c0_42 = arith.constant 0 : index
    %82 = vector.load %arg2[%c4_40, %c0_41, %c0_42] : memref<5x128x128xf32, #tpu.memory_space<vmem>>, vector<1x128x128xf32>
    %83 = vector.shape_cast %82 : vector<1x128x128xf32> to vector<128x128xf32>
    %cst_43 = arith.constant dense<0.000000e+00> : vector<32x128xf32>
    %84 = tpu.matmul %81, %83, %cst_43 {dimension_numbers = #tpu.dot_dimension_numbers<[1], [0], [0], [1], [0, 0, 1, 1], [], []>} : vector<32x128xf32>, vector<128x128xf32>, vector<32x128xf32> -> vector<32x128xf32>
    %85 = arith.addf %67, %84 : vector<32x128xf32>
    %86 = vector.broadcast %4 : vector<1x128xf32> to vector<32x128xf32>
    %87 = arith.addf %85, %86 : vector<32x128xf32>
    %cst_44 = arith.constant 5.000000e-01 : f32
    %88 = vector.broadcast %cst_44 : f32 to vector<32x128xf32>
    %89 = arith.mulf %88, %87 : vector<32x128xf32>
    %cst_45 = arith.constant 0.707106769 : f32
    %90 = vector.broadcast %cst_45 : f32 to vector<32x128xf32>
    %91 = arith.mulf %87, %90 : vector<32x128xf32>
    %92 = math.erf %91 : vector<32x128xf32>
    %cst_46 = arith.constant 1.000000e+00 : f32
    %93 = vector.broadcast %cst_46 : f32 to vector<32x128xf32>
    %94 = arith.addf %93, %92 : vector<32x128xf32>
    %95 = arith.mulf %89, %94 : vector<32x128xf32>
    %cst_47 = arith.constant 0.000000e+00 : f32
    %96 = vector.broadcast %cst_47 : f32 to vector<32x128xf32>
    %c2_i32_48 = arith.constant 2 : i32
    %97 = tpu.dynamic_rotate %95 by %c2_i32_48 dim 0 : vector<32x128xf32>, i32 -> vector<32x128xf32>
    %c-2_i32_49 = arith.constant -2 : i32
    %98 = vector.broadcast %c-2_i32_49 : i32 to vector<32x1xi32>
    %99 = arith.addi %3, %98 : vector<32x1xi32>
    %c0_i32_50 = arith.constant 0 : i32
    %100 = vector.broadcast %c0_i32_50 : i32 to vector<32x1xi32>
    %101 = arith.cmpi sge, %99, %100 : vector<32x1xi32>
    %c-2_i32_51 = arith.constant -2 : i32
    %102 = vector.broadcast %c-2_i32_51 : i32 to vector<32x1xi32>
    %103 = arith.addi %3, %102 : vector<32x1xi32>
    %c16_i32_52 = arith.constant 16 : i32
    %104 = vector.broadcast %c16_i32_52 : i32 to vector<32x1xi32>
    %105 = arith.cmpi slt, %103, %104 : vector<32x1xi32>
    %106 = arith.andi %101, %105 : vector<32x1xi1>
    %cst_53 = arith.constant 0.000000e+00 : f32
    %107 = vector.shape_cast %106 : vector<32x1xi1> to vector<32x1xi1>
    %108 = vector.broadcast %107 : vector<32x1xi1> to vector<32x128xi1>
    %109 = vector.broadcast %cst_53 : f32 to vector<32x128xf32>
    %110 = arith.select %108, %97, %109 : vector<32x128xi1>, vector<32x128xf32>
    %c0_54 = arith.constant 0 : index
    %c0_55 = arith.constant 0 : index
    %c0_56 = arith.constant 0 : index
    %111 = vector.load %arg3[%c0_54, %c0_55, %c0_56] : memref<5x128x128xf32, #tpu.memory_space<vmem>>, vector<1x128x128xf32>
    %112 = vector.shape_cast %111 : vector<1x128x128xf32> to vector<128x128xf32>
    %cst_57 = arith.constant dense<0.000000e+00> : vector<32x128xf32>
    %113 = tpu.matmul %110, %112, %cst_57 {dimension_numbers = #tpu.dot_dimension_numbers<[1], [0], [0], [1], [0, 0, 1, 1], [], []>} : vector<32x128xf32>, vector<128x128xf32>, vector<32x128xf32> -> vector<32x128xf32>
    %114 = arith.addf %96, %113 : vector<32x128xf32>
    %c1_i32_58 = arith.constant 1 : i32
    %115 = tpu.dynamic_rotate %95 by %c1_i32_58 dim 0 : vector<32x128xf32>, i32 -> vector<32x128xf32>
    %c-1_i32_59 = arith.constant -1 : i32
    %116 = vector.broadcast %c-1_i32_59 : i32 to vector<32x1xi32>
    %117 = arith.addi %3, %116 : vector<32x1xi32>
    %c0_i32_60 = arith.constant 0 : i32
    %118 = vector.broadcast %c0_i32_60 : i32 to vector<32x1xi32>
    %119 = arith.cmpi sge, %117, %118 : vector<32x1xi32>
    %c-1_i32_61 = arith.constant -1 : i32
    %120 = vector.broadcast %c-1_i32_61 : i32 to vector<32x1xi32>
    %121 = arith.addi %3, %120 : vector<32x1xi32>
    %c16_i32_62 = arith.constant 16 : i32
    %122 = vector.broadcast %c16_i32_62 : i32 to vector<32x1xi32>
    %123 = arith.cmpi slt, %121, %122 : vector<32x1xi32>
    %124 = arith.andi %119, %123 : vector<32x1xi1>
    %cst_63 = arith.constant 0.000000e+00 : f32
    %125 = vector.shape_cast %124 : vector<32x1xi1> to vector<32x1xi1>
    %126 = vector.broadcast %125 : vector<32x1xi1> to vector<32x128xi1>
    %127 = vector.broadcast %cst_63 : f32 to vector<32x128xf32>
    %128 = arith.select %126, %115, %127 : vector<32x128xi1>, vector<32x128xf32>
    %c1_64 = arith.constant 1 : index
    %c0_65 = arith.constant 0 : index
    %c0_66 = arith.constant 0 : index
    %129 = vector.load %arg3[%c1_64, %c0_65, %c0_66] : memref<5x128x128xf32, #tpu.memory_space<vmem>>, vector<1x128x128xf32>
    %130 = vector.shape_cast %129 : vector<1x128x128xf32> to vector<128x128xf32>
    %cst_67 = arith.constant dense<0.000000e+00> : vector<32x128xf32>
    %131 = tpu.matmul %128, %130, %cst_67 {dimension_numbers = #tpu.dot_dimension_numbers<[1], [0], [0], [1], [0, 0, 1, 1], [], []>} : vector<32x128xf32>, vector<128x128xf32>, vector<32x128xf32> -> vector<32x128xf32>
    %132 = arith.addf %114, %131 : vector<32x128xf32>
    %c2_68 = arith.constant 2 : index
    %c0_69 = arith.constant 0 : index
    %c0_70 = arith.constant 0 : index
    %133 = vector.load %arg3[%c2_68, %c0_69, %c0_70] : memref<5x128x128xf32, #tpu.memory_space<vmem>>, vector<1x128x128xf32>
    %134 = vector.shape_cast %133 : vector<1x128x128xf32> to vector<128x128xf32>
    %cst_71 = arith.constant dense<0.000000e+00> : vector<32x128xf32>
    %135 = tpu.matmul %95, %134, %cst_71 {dimension_numbers = #tpu.dot_dimension_numbers<[1], [0], [0], [1], [0, 0, 1, 1], [], []>} : vector<32x128xf32>, vector<128x128xf32>, vector<32x128xf32> -> vector<32x128xf32>
    %136 = arith.addf %132, %135 : vector<32x128xf32>
    %c31_i32_72 = arith.constant 31 : i32
    %137 = tpu.dynamic_rotate %95 by %c31_i32_72 dim 0 : vector<32x128xf32>, i32 -> vector<32x128xf32>
    %c1_i32_73 = arith.constant 1 : i32
    %138 = vector.broadcast %c1_i32_73 : i32 to vector<32x1xi32>
    %139 = arith.addi %3, %138 : vector<32x1xi32>
    %c0_i32_74 = arith.constant 0 : i32
    %140 = vector.broadcast %c0_i32_74 : i32 to vector<32x1xi32>
    %141 = arith.cmpi sge, %139, %140 : vector<32x1xi32>
    %c1_i32_75 = arith.constant 1 : i32
    %142 = vector.broadcast %c1_i32_75 : i32 to vector<32x1xi32>
    %143 = arith.addi %3, %142 : vector<32x1xi32>
    %c16_i32_76 = arith.constant 16 : i32
    %144 = vector.broadcast %c16_i32_76 : i32 to vector<32x1xi32>
    %145 = arith.cmpi slt, %143, %144 : vector<32x1xi32>
    %146 = arith.andi %141, %145 : vector<32x1xi1>
    %cst_77 = arith.constant 0.000000e+00 : f32
    %147 = vector.shape_cast %146 : vector<32x1xi1> to vector<32x1xi1>
    %148 = vector.broadcast %147 : vector<32x1xi1> to vector<32x128xi1>
    %149 = vector.broadcast %cst_77 : f32 to vector<32x128xf32>
    %150 = arith.select %148, %137, %149 : vector<32x128xi1>, vector<32x128xf32>
    %c3_78 = arith.constant 3 : index
    %c0_79 = arith.constant 0 : index
    %c0_80 = arith.constant 0 : index
    %151 = vector.load %arg3[%c3_78, %c0_79, %c0_80] : memref<5x128x128xf32, #tpu.memory_space<vmem>>, vector<1x128x128xf32>
    %152 = vector.shape_cast %151 : vector<1x128x128xf32> to vector<128x128xf32>
    %cst_81 = arith.constant dense<0.000000e+00> : vector<32x128xf32>
    %153 = tpu.matmul %150, %152, %cst_81 {dimension_numbers = #tpu.dot_dimension_numbers<[1], [0], [0], [1], [0, 0, 1, 1], [], []>} : vector<32x128xf32>, vector<128x128xf32>, vector<32x128xf32> -> vector<32x128xf32>
    %154 = arith.addf %136, %153 : vector<32x128xf32>
    %c30_i32_82 = arith.constant 30 : i32
    %155 = tpu.dynamic_rotate %95 by %c30_i32_82 dim 0 : vector<32x128xf32>, i32 -> vector<32x128xf32>
    %c2_i32_83 = arith.constant 2 : i32
    %156 = vector.broadcast %c2_i32_83 : i32 to vector<32x1xi32>
    %157 = arith.addi %3, %156 : vector<32x1xi32>
    %c0_i32_84 = arith.constant 0 : i32
    %158 = vector.broadcast %c0_i32_84 : i32 to vector<32x1xi32>
    %159 = arith.cmpi sge, %157, %158 : vector<32x1xi32>
    %c2_i32_85 = arith.constant 2 : i32
    %160 = vector.broadcast %c2_i32_85 : i32 to vector<32x1xi32>
    %161 = arith.addi %3, %160 : vector<32x1xi32>
    %c16_i32_86 = arith.constant 16 : i32
    %162 = vector.broadcast %c16_i32_86 : i32 to vector<32x1xi32>
    %163 = arith.cmpi slt, %161, %162 : vector<32x1xi32>
    %164 = arith.andi %159, %163 : vector<32x1xi1>
    %cst_87 = arith.constant 0.000000e+00 : f32
    %165 = vector.shape_cast %164 : vector<32x1xi1> to vector<32x1xi1>
    %166 = vector.broadcast %165 : vector<32x1xi1> to vector<32x128xi1>
    %167 = vector.broadcast %cst_87 : f32 to vector<32x128xf32>
    %168 = arith.select %166, %155, %167 : vector<32x128xi1>, vector<32x128xf32>
    %c4_88 = arith.constant 4 : index
    %c0_89 = arith.constant 0 : index
    %c0_90 = arith.constant 0 : index
    %169 = vector.load %arg3[%c4_88, %c0_89, %c0_90] : memref<5x128x128xf32, #tpu.memory_space<vmem>>, vector<1x128x128xf32>
    %170 = vector.shape_cast %169 : vector<1x128x128xf32> to vector<128x128xf32>
    %cst_91 = arith.constant dense<0.000000e+00> : vector<32x128xf32>
    %171 = tpu.matmul %168, %170, %cst_91 {dimension_numbers = #tpu.dot_dimension_numbers<[1], [0], [0], [1], [0, 0, 1, 1], [], []>} : vector<32x128xf32>, vector<128x128xf32>, vector<32x128xf32> -> vector<32x128xf32>
    %172 = arith.addf %154, %171 : vector<32x128xf32>
    %173 = vector.broadcast %5 : vector<1x128xf32> to vector<32x128xf32>
    %174 = arith.addf %172, %173 : vector<32x128xf32>
    %cst_92 = arith.constant 5.000000e-01 : f32
    %175 = vector.broadcast %cst_92 : f32 to vector<32x128xf32>
    %176 = arith.mulf %175, %174 : vector<32x128xf32>
    %cst_93 = arith.constant 0.707106769 : f32
    %177 = vector.broadcast %cst_93 : f32 to vector<32x128xf32>
    %178 = arith.mulf %174, %177 : vector<32x128xf32>
    %179 = math.erf %178 : vector<32x128xf32>
    %cst_94 = arith.constant 1.000000e+00 : f32
    %180 = vector.broadcast %cst_94 : f32 to vector<32x128xf32>
    %181 = arith.addf %180, %179 : vector<32x128xf32>
    %182 = arith.mulf %176, %181 : vector<32x128xf32>
    %183 = arith.addf %182, %1 : vector<32x128xf32>
    %c0_95 = arith.constant 0 : index
    %c0_96 = arith.constant 0 : index
    %184 = vector.load %arg4[%c0_95, %c0_96] : memref<128x128xf32, #tpu.memory_space<vmem>>, vector<128x128xf32>
    %cst_97 = arith.constant dense<0.000000e+00> : vector<32x128xf32>
    %185 = tpu.matmul %183, %184, %cst_97 {dimension_numbers = #tpu.dot_dimension_numbers<[1], [0], [0], [1], [0, 0, 1, 1], [], []>} : vector<32x128xf32>, vector<128x128xf32>, vector<32x128xf32> -> vector<32x128xf32>
    %186 = vector.broadcast %6 : vector<1x128xf32> to vector<32x128xf32>
    %187 = arith.addf %185, %186 : vector<32x128xf32>
    %cst_98 = arith.constant 5.000000e-01 : f32
    %188 = vector.broadcast %cst_98 : f32 to vector<32x128xf32>
    %189 = arith.mulf %188, %187 : vector<32x128xf32>
    %cst_99 = arith.constant 0.707106769 : f32
    %190 = vector.broadcast %cst_99 : f32 to vector<32x128xf32>
    %191 = arith.mulf %187, %190 : vector<32x128xf32>
    %192 = math.erf %191 : vector<32x128xf32>
    %cst_100 = arith.constant 1.000000e+00 : f32
    %193 = vector.broadcast %cst_100 : f32 to vector<32x128xf32>
    %194 = arith.addf %193, %192 : vector<32x128xf32>
    %195 = arith.mulf %189, %194 : vector<32x128xf32>
    %196 = vector.broadcast %7 : vector<1x128xf32> to vector<32x128xf32>
    %197 = arith.mulf %195, %196 : vector<32x128xf32>
    %198 = vector.broadcast %8 : vector<1x128xf32> to vector<32x128xf32>
    %199 = arith.addf %197, %198 : vector<32x128xf32>
    %200 = vector.shape_cast %199 : vector<32x128xf32> to vector<2x16x128xf32>
    %c0_101 = arith.constant 0 : index
    %c0_102 = arith.constant 0 : index
    %c0_103 = arith.constant 0 : index
    %201 = vector.load %arg6[%c0_101, %c0_102, %c0_103] : memref<2x16x128xf32, #tpu.memory_space<vmem>>, vector<2x16x128xf32>
    tpu.vector_store %arg6[%c0_101, %c0_102, %c0_103], %200 {strides = array<i32>} : memref<2x16x128xf32, #tpu.memory_space<vmem>>, vector<2x16x128xf32>,
    return
  }
  func.func @transform_0(%arg0: i32) -> (i32, i32, i32) {
    %c0_i32 = arith.constant 0 : i32
    %c0_i32_0 = arith.constant 0 : i32
    %c0_i32_1 = arith.constant 0 : i32
    %c0_i32_2 = arith.constant 0 : i32
    return %c0_i32, %c0_i32_0, %c0_i32_1 : i32, i32, i32
  }
  func.func @transform_1(%arg0: i32) -> (i32, i32, i32) {
    %c0_i32 = arith.constant 0 : i32
    %c0_i32_0 = arith.constant 0 : i32
    %c0_i32_1 = arith.constant 0 : i32
    %c0_i32_2 = arith.constant 0 : i32
    return %c0_i32, %c0_i32_0, %c0_i32_1 : i32, i32, i32
  }
  func.func @transform_2(%arg0: i32) -> (i32, i32, i32) {
    %c0_i32 = arith.constant 0 : i32
    %c0_i32_0 = arith.constant 0 : i32
    %c0_i32_1 = arith.constant 0 : i32
    %c0_i32_2 = arith.constant 0 : i32
    return %c0_i32, %c0_i32_0, %c0_i32_1 : i32, i32, i32
  }
  func.func @transform_3(%arg0: i32) -> (i32, i32) {
    %c0_i32 = arith.constant 0 : i32
    %c0_i32_0 = arith.constant 0 : i32
    %c0_i32_1 = arith.constant 0 : i32
    return %c0_i32, %c0_i32_0 : i32, i32
  }
  func.func @transform_4(%arg0: i32) -> (i32, i32) {
    %c0_i32 = arith.constant 0 : i32
    %c0_i32_0 = arith.constant 0 : i32
    %c0_i32_1 = arith.constant 0 : i32
    return %c0_i32, %c0_i32_0 : i32, i32
  }
  func.func @transform_5(%arg0: i32) -> (i32, i32, i32) {
    %c0_i32 = arith.constant 0 : i32
    %c0_i32_0 = arith.constant 0 : i32
    %c0_i32_1 = arith.constant 0 : i32
    %c0_i32_2 = arith.constant 0 : i32
    return %c0_i32, %c0_i32_0, %c0_i32_1 : i32, i32, i32
  }
}

</mosaic_0001>

<bundles_post_ra>
// kernel: tpu_custom_call.1
= control target key start
LH: loop header
LB: loop body
LE: loop exit
PB: predicated region body
PF: predicated region fallthrough
CT: control target
= control target key end

     0   :  { %10 = vsyncpa [#allocation3], 0  ;;  %s3052_s0 = inlined_call_operand.hbm [shape: f32[2,16,128], index: 0, kind: input, shape index: {}]   ;;  %s3053_s1 = inlined_call_operand.hbm [shape: f32[5,128,128], index: 1, kind: input, shape index: {}]   ;;  %s3054_s2 = inlined_call_operand.hbm [shape: f32[5,128,128], index: 2, kind: input, shape index: {}]   ;;  %s3055_s3 = inlined_call_operand.hbm [shape: f32[128,128], index: 3, kind: input, shape index: {}]   ;;  %s3056_s4 = inlined_call_operand.vmem [shape: f32[8,128], index: 4, kind: input, shape index: {}]   ;;  %s3057_s5 = inlined_call_operand.hbm [shape: f32[2,16,128], index: 5, kind: output, shape index: {}]  }
   0x1   :  { %11 = vsyncpa [#allocation6], 0 }
   0x2   :  { %12 = vsyncpa [#allocation9], 0 }
   0x3   :  { %13 = vsyncpa [#allocation4], 0  ;;  %s2714_s18 = smov [#allocation5]   ;;  %s2715_s20 = smov [#allocation2]  }
   0x4   :  { %s31_s19 = sshll.u32 %s2714_s18, 4  ;;  %s19_s21 = sshll.u32 %s2715_s20, 4  ;;  %s32_s19 = int_to_ptr.vmem [resolvable:$true] %s31_s19  ;;  %s2751_s21 = int_to_ptr.vmem [resolvable:$true] %s19_s21 }
   0x5   :  { %s2596_s24 = scalar_lea.hbm %s3053_s1, 10240 }
   0x6   :  { %p2597_p0 = scmp.ne.s32.totalorder %s3053_s1, %s2596_s24  ;;  %p2600_p1 = scmp.lt.u32.totalorder %s2596_s24, %s3053_s1 }
   0x8   :  { %p2602_p2 = pnand %p2600_p1, %p2597_p0 }
   0xa   :  { %2605 = shalt.err (!%p2602_p2)
}
   0xb   :  { %s2606_s29 = scalar_lea.vmem %s32_s19, 10240  ;;  %p2611_p4 = scmp.lt.s32.totalorder %s32_s19, %s32_s19 }
   0xc   :  { %p2607_p3 = scmp.ne.s32.totalorder %s32_s19, %s2606_s29  ;;  %p2612_p5 = scmp.lt.s32.totalorder %s2606_s29, %s2606_s29 }
   0xe   :  { %p2613_p6 = por %p2612_p5, %p2611_p4 }
  0x10   :  { %p2614_p7 = pnand %p2613_p6, %p2607_p3 }
  0x12   :  { %2617 = shalt.err (!%p2614_p7)
}
  0x13   :  { %s2716_s30 = smov 128   ;;  %s2717_s6 = smov 8  }
  0x14   :  { %37 = dma.hbm_to_vmem [thread:$0]  %s3053_s1, 10240, %s32_s19, [#allocation6], %s2716_s30, %s2716_s30, %s2717_s6  }
  0x15   :  { %s2618_s11 = scalar_lea.hbm %s3052_s0, 512 }
  0x16   :  { %p2619_p8 = scmp.ne.s32.totalorder %s3052_s0, %s2618_s11  ;;  %p2622_p9 = scmp.lt.u32.totalorder %s2618_s11, %s3052_s0 }
  0x18   :  { %p2624_p10 = pnand %p2622_p9, %p2619_p8 }
  0x1a   :  { %2627 = shalt.err (!%p2624_p10)
}
  0x1b   :  { %s2628_s16 = scalar_lea.vmem %s2751_s21, 512  ;;  %p2633_p12 = scmp.lt.s32.totalorder %s2751_s21, %s2751_s21 }
  0x1c   :  { %p2629_p11 = scmp.ne.s32.totalorder %s2751_s21, %s2628_s16  ;;  %p2634_p13 = scmp.lt.s32.totalorder %s2628_s16, %s2628_s16 }
  0x1e   :  { %p2635_p0 = por %p2634_p13, %p2633_p12 }
  0x20   :  { %p2636_p1 = pnand %p2635_p0, %p2629_p11 }
  0x22   :  { %2639 = shalt.err (!%p2636_p1)
}
  0x23   :  { %25 = dma.hbm_to_vmem [thread:$0]  %s3052_s0, 512, %s2751_s21, [#allocation3], %s2716_s30, %s2716_s30, %s2717_s6  }
  0x24   :  { %s2718_s18 = smov [#allocation7]   ;;  %s2719_s20 = smov [#allocation8]  }
  0x25   :  { %s43_s19 = sshll.u32 %s2718_s18, 4  ;;  %s55_s22 = sshll.u32 %s2719_s20, 4  ;;  %s44_s19 = int_to_ptr.vmem [resolvable:$true] %s43_s19  ;;  %s2788_s22 = int_to_ptr.vmem [resolvable:$true] %s55_s22 }
  0x26   :  { %s2640_s25 = scalar_lea.hbm %s3054_s2, 10240 }
  0x27   :  { %p2641_p2 = scmp.ne.s32.totalorder %s3054_s2, %s2640_s25  ;;  %p2644_p3 = scmp.lt.u32.totalorder %s2640_s25, %s3054_s2 }
  0x29   :  { %p2646_p4 = pnand %p2644_p3, %p2641_p2 }
  0x2b   :  { %2649 = shalt.err (!%p2646_p4)
}
  0x2c   :  { %s2650_s0 = scalar_lea.vmem %s44_s19, 10240  ;;  %p2655_p6 = scmp.lt.s32.totalorder %s44_s19, %s44_s19 }
  0x2d   :  { %p2651_p5 = scmp.ne.s32.totalorder %s44_s19, %s2650_s0  ;;  %p2656_p7 = scmp.lt.s32.totalorder %s2650_s0, %s2650_s0 }
  0x2f   :  { %p2657_p8 = por %p2656_p7, %p2655_p6 }
  0x31   :  { %p2658_p9 = pnand %p2657_p8, %p2651_p5 }
  0x33   :  { %2661 = shalt.err (!%p2658_p9)
}
  0x34   :  { %49 = dma.hbm_to_vmem [thread:$0]  %s3054_s2, 10240, %s44_s19, [#allocation6], %s2716_s30, %s2716_s30, %s2717_s6  }
  0x35   :  { %s2662_s10 = scalar_lea.hbm %s3055_s3, 2048 }
  0x36   :  { %p2663_p10 = scmp.ne.s32.totalorder %s3055_s3, %s2662_s10  ;;  %p2666_p11 = scmp.lt.u32.totalorder %s2662_s10, %s3055_s3 }
  0x38   :  { %p2668_p12 = pnand %p2666_p11, %p2663_p10 }
  0x3a   :  { %2671 = shalt.err (!%p2668_p12)
}
  0x3b   :  { %s2672_s15 = scalar_lea.vmem %s2788_s22, 2048  ;;  %p2677_p0 = scmp.lt.s32.totalorder %s2788_s22, %s2788_s22 }
  0x3c   :  { %p2673_p13 = scmp.ne.s32.totalorder %s2788_s22, %s2672_s15  ;;  %p2678_p1 = scmp.lt.s32.totalorder %s2672_s15, %s2672_s15 }
  0x3e   :  { %p2679_p2 = por %p2678_p1, %p2677_p0 }
  0x40   :  { %p2680_p3 = pnand %p2679_p2, %p2673_p13 }
  0x42   :  { %2683 = shalt.err (!%p2680_p3)
}
  0x43   :  { %61 = dma.hbm_to_vmem [thread:$0]  %s3055_s3, 2048, %s2788_s22, [#allocation9], %s2716_s30, %s2716_s30, %s2717_s6  }
  0x44   :  { %2706 = dma.done.wait [#allocation3], 512  }
  0x45   :  { %2707 = vsyncadd [#allocation3], 4294966784 }
  0x46   :  { %2708 = dma.done.wait [#allocation6], 20480  }
  0x47   :  { %2709 = vsyncadd [#allocation6], 4294946816 }
  0x48   :  { %2710 = dma.done.wait [#allocation9], 2048  }
  0x49   :  { %2711 = vsyncadd [#allocation9], 4294965248  ;;  %v80_v0 = vlaneseq  ;;  %v155_v2 = vld [vmem:[#allocation5 + $0x80] sm:$0xff]  ;;  %v156_v3 = vld [vmem:[#allocation5 + $0x88] sm:$0xff]  ;;  %s2720_s26 = smov [#allocation10]  }
  0x4a   :  { %v157_v4 = vld [vmem:[#allocation5 + $0x90] sm:$0xff]  ;;  %v2161_v5 = vpack.c.bf16 %v156_v3, %v155_v2  ;;  %v158_v6 = vld [vmem:[#allocation5 + $0x98] sm:$0xff]  ;;  %v159_v8 = vld [vmem:[#allocation5 + $0xa0] sm:$0xff]  ;;  %s1488_s27 = sshll.u32 %s2720_s26, 4  ;;  %s1489_s27 = int_to_ptr.vmem [resolvable:$true] %s1488_s27 }
  0x4b   :  { %v2825_v1 = vshrl.u32 %v80_v0, 7  ;;  %v2165_v7 = vpack.c.bf16 %v158_v6, %v157_v4  ;;  %v160_v9 = vld [vmem:[#allocation5 + $0xa8] sm:$0xff]  ;;  %v2830_v12 = vld [vmem:[#allocation2] sm:$0xff]  ;;  %v2832_v13 = vld [vmem:[#allocation2 + $0x18] sm:$0xff]  ;;  %p2689_p5 = scmp.lt.s32.totalorder %s1489_s27, %s1489_s27 }
  0x4c   :  { %2162 = vmatprep.subr.bf16.mxu0 %v2161_v5  ;;  %v2169_v11 = vpack.c.bf16 %v160_v9, %v159_v8  ;;  %v161_v14 = vld [vmem:[#allocation5 + $0xb0] sm:$0xff]  ;;  %v162_v15 = vld [vmem:[#allocation5 + $0xb8] sm:$0xff]  ;;  %v129_v16 = vrot.slane %v2830_v12, 7  ;;  %v132_v17 = vrot.slane %v2832_v13, 7  ;;  %v163_v20 = vld [vmem:[#allocation5 + $0xc0] sm:$0xff]  ;;  %v88_v45 = vrot.slane %v2830_v12, 6 }
  0x4d   :  { %v2828_v10 = vadd.s32 4294967295, %v2825_v1  ;;  %2164 = vmatpush3.bf16.msra.mxu0 %v2161_v5  ;;  %vm133_vm0 = vcmp.lt.s32.totalorder %v2825_v1, 1  ;;  %v2173_v19 = vpack.c.bf16 %v162_v15, %v161_v14  ;;  %v164_v21 = vld [vmem:[#allocation5 + $0xc8] sm:$0xff]  ;;  %v165_v23 = vld [vmem:[#allocation5 + $0xd0] sm:$0xff]  ;;  %v166_v24 = vld [vmem:[#allocation5 + $0xd8] sm:$0xff]  ;;  %v2851_v42 = vadd.s32 4294967294, %v2825_v1 }
  0x4e   :  { %2166 = vmatprep.subr.bf16.mxu0 %v2165_v7  ;;  %v137_v18 = vsel %vm133_vm0, %v132_v17, %v129_v16  ;;  %v2177_v22 = vpack.c.bf16 %v164_v21, %v163_v20  ;;  %v2181_v25 = vpack.c.bf16 %v166_v24, %v165_v23  ;;  %v167_v26 = vld [vmem:[#allocation5 + $0xe0] sm:$0xff]  ;;  %v168_v27 = vld [vmem:[#allocation5 + $0xe8] sm:$0xff]  ;;  %v169_v29 = vld [vmem:[#allocation5 + $0xf0] sm:$0xff]  ;;  %v91_v46 = vrot.slane %v2832_v13, 6 }
  0x4f   :  { %vm140_vm1 = vcmp.ge.s32.totalorder %v2828_v10, 0  ;;  %v2185_v28 = vpack.c.bf16 %v168_v27, %v167_v26  ;;  %v170_v30 = vld [vmem:[#allocation5 + $0xf8] sm:$0xff]  ;;  %v2842_v32 = vld [vmem:[#allocation2 + $0x8] sm:$0xff]  ;;  %v113_v33 = vld [vmem:[#allocation5] sm:$0xff]  ;;  %vm92_vm2 = vcmp.lt.s32.totalorder %v2825_v1, 2  ;;  %vm99_vm3 = vcmp.ge.s32.totalorder %v2851_v42, 0 }
  0x50   :  { %1775 = vmatprep.mubr.msk.f32.mxu0 %vm140_vm1, %v137_v18  ;;  %v2189_v31 = vpack.c.bf16 %v170_v30, %v169_v29  ;;  %v114_v34 = vld [vmem:[#allocation5 + $0x8] sm:$0xff]  ;;  %v2844_v35 = vld [vmem:[#allocation2 + $0x10] sm:$0xff]  ;;  %v130_v36 = vrot.slane %v2842_v32, 7  ;;  %v116_v40 = vld [vmem:[#allocation5 + $0x18] sm:$0xff]  ;;  %v96_v51 = vsel %vm92_vm2, %v91_v46, %v88_v45  ;;  %v89_v15 = vrot.slane %v2842_v32, 6 }
  0x51   :  { %2168 = vmatpush3.bf16.msra.mxu0 %v2165_v7  ;;  %v2193_v37 = vpack.c.bf16 %v114_v34, %v113_v33  ;;  %v131_v38 = vrot.slane %v2844_v35, 7  ;;  %v115_v39 = vld [vmem:[#allocation5 + $0x10] sm:$0xff]  ;;  %v117_v47 = vld [vmem:[#allocation5 + $0x20] sm:$0xff]  ;;  %v118_v48 = vld [vmem:[#allocation5 + $0x28] sm:$0xff]  ;;  %vm451_vm4 = vcmp.lt.s32.totalorder %v2825_v1, 7  ;;  %vm582_vm6 = vcmp.lt.s32.totalorder %v2825_v1, 6 }
  0x52   :  { %2170 = vmatprep.subr.bf16.mxu0 %v2169_v11  ;;  %v136_v41 = vsel %vm133_vm0, %v129_v16, %v130_v36  ;;  %v2197_v43 = vpack.c.bf16 %v116_v40, %v115_v39  ;;  %v2201_v50 = vpack.c.bf16 %v118_v48, %v117_v47  ;;  %v119_v52 = vld [vmem:[#allocation5 + $0x30] sm:$0xff]  ;;  %v120_v53 = vld [vmem:[#allocation5 + $0x38] sm:$0xff]  ;;  %v778_v54 = vld [vmem:[#allocation7 + $0x80] sm:$0xff]  ;;  %v95_v20 = vsel %vm92_vm2, %v88_v45, %v89_v15 }
  0x53   :  { %v135_v44 = vsel %vm133_vm0, %v130_v36, %v131_v38  ;;  %v134_v49 = vsel %vm133_vm0, %v131_v38, %v132_v17  ;;  %v779_v55 = vld [vmem:[#allocation7 + $0x88] sm:$0xff]  ;;  %v780_v56 = vld [vmem:[#allocation7 + $0x90] sm:$0xff]  ;;  %v781_v58 = vld [vmem:[#allocation7 + $0x98] sm:$0xff]  ;;  %v2205_v59 = vpack.c.bf16 %v120_v53, %v119_v52  ;;  %v90_v17 = vrot.slane %v2844_v35, 6 }
  0x54   :  { %v2321_v57 = vpack.c.bf16 %v779_v55, %v778_v54  ;;  %v2325_v60 = vpack.c.bf16 %v781_v58, %v780_v56  ;;  %v121_v61 = vld [vmem:[#allocation5 + $0x40] sm:$0xff]  ;;  %v122_v62 = vld [vmem:[#allocation5 + $0x48] sm:$0xff]  ;;  %v123_v0 = vld [vmem:[#allocation5 + $0x50] sm:$0xff]  ;;  %v448_v52 = vrot.slane %v2842_v32, 1 }
  0x55   :  { %2172 = vmatpush3.bf16.msra.mxu0 %v2169_v11  ;;  %v2209_v63 = vpack.c.bf16 %v122_v62, %v121_v61  ;;  %v124_v2 = vld [vmem:[#allocation5 + $0x58] sm:$0xff]  ;;  %v125_v4 = vld [vmem:[#allocation5 + $0x60] sm:$0xff]  ;;  %v126_v5 = vld [vmem:[#allocation5 + $0x68] sm:$0xff] }
  0x56   :  { %2174 = vmatprep.subr.bf16.mxu0 %v2173_v19  ;;  %2322 = vmatprep.subr.bf16.mxu1 %v2321_v57  ;;  %v2213_v3 = vpack.c.bf16 %v124_v2, %v123_v0  ;;  %v2217_v6 = vpack.c.bf16 %v126_v5, %v125_v4  ;;  %v127_v7 = vld [vmem:[#allocation5 + $0x70] sm:$0xff]  ;;  %v128_v8 = vld [vmem:[#allocation5 + $0x78] sm:$0xff]  ;;  %v342_v11 = vld [vmem:[#allocation5 + $0x100] sm:$0xff] }
  0x57   :  { %2324 = vmatpush3.bf16.msra.mxu1 %v2321_v57  ;;  %v2221_v9 = vpack.c.bf16 %v128_v8, %v127_v7  ;;  %v343_v14 = vld [vmem:[#allocation5 + $0x108] sm:$0xff]  ;;  %v344_v18 = vld [vmem:[#allocation5 + $0x110] sm:$0xff]  ;;  %v346_v23 = vld [vmem:[#allocation5 + $0x120] sm:$0xff]  ;;  %v82_v8 = vadd.s32 8, %v2825_v1 }
  0x58   :  { %2326 = vmatprep.subr.bf16.mxu1 %v2325_v60  ;;  %v2225_v16 = vpack.c.bf16 %v343_v14, %v342_v11  ;;  %v347_v24 = vld [vmem:[#allocation5 + $0x128] sm:$0xff]  ;;  %v348_v27 = vld [vmem:[#allocation5 + $0x130] sm:$0xff]  ;;  %v350_v30 = vld [vmem:[#allocation5 + $0x140] sm:$0xff] }
  0x59   :  { %2176 = vmatpush3.bf16.msra.mxu0 %v2173_v19  ;;  %v345_v19 = vld [vmem:[#allocation5 + $0x118] sm:$0xff]  ;;  %v2233_v26 = vpack.c.bf16 %v347_v24, %v346_v23  ;;  %v352_v34 = vld [vmem:[#allocation5 + $0x150] sm:$0xff]  ;;  %v354_v38 = vld [vmem:[#allocation5 + $0x160] sm:$0xff]  ;;  %v578_v24 = vrot.slane %v2830_v12, 2 }
  0x5a   :  { %2178 = vmatprep.subr.bf16.mxu0 %v2177_v22  ;;  %v2229_v21 = vpack.c.bf16 %v345_v19, %v344_v18  ;;  %v353_v36 = vld [vmem:[#allocation5 + $0x158] sm:$0xff]  ;;  %v355_v39 = vld [vmem:[#allocation5 + $0x168] sm:$0xff]  ;;  %v473_v45 = vld [vmem:[#allocation5 + $0x180] sm:$0xff]  ;;  %v450_v18 = vrot.slane %v2832_v13, 1 }
  0x5b   :  { %2328 = vmatpush3.bf16.msra.mxu1 %v2325_v60  ;;  %v2249_v40 = vpack.c.bf16 %v355_v39, %v354_v38  ;;  %v475_v48 = vld [vmem:[#allocation5 + $0x190] sm:$0xff]  ;;  %v477_v53 = vld [vmem:[#allocation5 + $0x1a0] sm:$0xff]  ;;  %v478_v54 = vld [vmem:[#allocation5 + $0x1a8] sm:$0xff] }
  0x5c   :  { %v2265_v55 = vpack.c.bf16 %v478_v54, %v477_v53  ;;  %v479_v57 = vld [vmem:[#allocation5 + $0x1b0] sm:$0xff]  ;;  %v480_v58 = vld [vmem:[#allocation5 + $0x1b8] sm:$0xff]  ;;  %v481_v60 = vld [vmem:[#allocation5 + $0x1c0] sm:$0xff] }
  0x5d   :  { %2180 = vmatpush3.bf16.msra.mxu0 %v2177_v22  ;;  %v94_v22 = vsel %vm92_vm2, %v89_v15, %v90_v17  ;;  %v482_v61 = vld [vmem:[#allocation5 + $0x1c8] sm:$0xff]  ;;  %v484_v0 = vld [vmem:[#allocation5 + $0x1d8] sm:$0xff]  ;;  %v604_v11 = vld [vmem:[#allocation5 + $0x200] sm:$0xff]  ;;  %v449_v15 = vrot.slane %v2844_v35, 1 }
  0x5e   :  { %2182 = vmatprep.subr.bf16.mxu0 %v2181_v25  ;;  %v2273_v62 = vpack.c.bf16 %v482_v61, %v481_v60  ;;  %v486_v4 = vld [vmem:[#allocation5 + $0x1e8] sm:$0xff]  ;;  %v488_v7 = vld [vmem:[#allocation5 + $0x1f8] sm:$0xff]  ;;  %v606_v19 = vld [vmem:[#allocation5 + $0x210] sm:$0xff] }
  0x5f   :  { %v605_v14 = vld [vmem:[#allocation5 + $0x208] sm:$0xff]  ;;  %v452_v23 = vsel %vm451_vm4, %v449_v15, %v450_v18  ;;  %v615_v38 = vld [vmem:[#allocation5 + $0x258] sm:$0xff]  ;;  %v784_v54 = vld [vmem:[#allocation7 + $0xb0] sm:$0xff] }
  0x60   :  { %v788_v60 = vld [vmem:[#allocation7 + $0xd0] sm:$0xff]  ;;  %v789_v61 = vld [vmem:[#allocation7 + $0xd8] sm:$0xff]  ;;  %v1346_v1 = vld [vmem:[#allocation8 + $0x40] sm:$0xff] }
  0x61   :  { %2184 = vmatpush3.bf16.msra.mxu0 %v2181_v25  ;;  %v93_v25 = vsel %vm92_vm2, %v90_v17, %v91_v46  ;;  %v474_v46 = vld [vmem:[#allocation5 + $0x188] sm:$0xff]  ;;  %v2289_v17 = vpack.c.bf16 %v605_v14, %v604_v11 }
  0x62   :  { %2186 = vmatprep.subr.bf16.mxu0 %v2185_v28  ;;  %v2257_v47 = vpack.c.bf16 %v474_v46, %v473_v45  ;;  %v619_v45 = vld [vmem:[#allocation5 + $0x278] sm:$0xff] }
  0x65   :  { %2188 = vmatpush3.bf16.msra.mxu0 %v2185_v28  ;;  %v349_v28 = vld [vmem:[#allocation5 + $0x138] sm:$0xff] }
  0x66   :  { %2190 = vmatprep.subr.bf16.mxu0 %v2189_v31  ;;  %v2237_v29 = vpack.c.bf16 %v349_v28, %v348_v27  ;;  %v609_v27 = vld [vmem:[#allocation5 + $0x228] sm:$0xff] }
  0x69   :  { %2192 = vmatpush3.bf16.msra.mxu0 %v2189_v31  ;;  %v351_v31 = vld [vmem:[#allocation5 + $0x148] sm:$0xff] }
  0x6a   :  { %2194 = vmatprep.subr.bf16.mxu0 %v2193_v37  ;;  %v2241_v33 = vpack.c.bf16 %v351_v31, %v350_v30  ;;  %v611_v31 = vld [vmem:[#allocation5 + $0x238] sm:$0xff] }
  0x6c   :  { %1776 = vmatmul.mubr.f32.vlgmr.msra.gmra.mrb[0].mxu0 %v136_v41  ;;  %v356_v41 = vld [vmem:[#allocation5 + $0x170] sm:$0xff] }
  0x6d   :  { %2196 = vmatpush3.bf16.msra.mxu0 %v2193_v37  ;;  %1778 = vmatprep.mubr.msk.f32.mxu0 %vm140_vm1, %v135_v44  ;;  %v2245_v37 = vpack.c.bf16 %v353_v36, %v352_v34  ;;  %v612_v34 = vld [vmem:[#allocation5 + $0x240] sm:$0xff]  ;;  %v613_v36 = vld [vmem:[#allocation5 + $0x248] sm:$0xff] }
  0x6e   :  { %2198 = vmatprep.subr.bf16.mxu0 %v2197_v43 }
  0x70   :  { %1779 = vmatmul.mubr.f32.gmra.mrb[2].mxu0 %v134_v49  ;;  %v476_v49 = vld [vmem:[#allocation5 + $0x198] sm:$0xff] }
  0x71   :  { %2200 = vmatpush3.bf16.msra.mxu0 %v2197_v43  ;;  %1813 = vmatprep.mubr.msk.f32.mxu0 %vm99_vm3, %v96_v51  ;;  %v357_v43 = vld [vmem:[#allocation5 + $0x178] sm:$0xff]  ;;  %v447_v51 = vrot.slane %v2830_v12, 1 }
  0x72   :  { %2202 = vmatprep.subr.bf16.mxu0 %v2201_v50  ;;  %v2253_v44 = vpack.c.bf16 %v357_v43, %v356_v41  ;;  %v617_v41 = vld [vmem:[#allocation5 + $0x268] sm:$0xff] }
  0x73   :  { %v454_v56 = vsel %vm451_vm4, %v447_v51, %v448_v52  ;;  %v455_v28 = vsel %vm451_vm4, %v450_v18, %v447_v51 }
  0x75   :  { %2204 = vmatpush3.bf16.msra.mxu0 %v2201_v50  ;;  %v2261_v50 = vpack.c.bf16 %v476_v49, %v475_v48  ;;  %v2916_v48 = vadd.s32 2, %v82_v8  ;;  %v581_v49 = vrot.slane %v2832_v13, 2 }
  0x76   :  { %2206 = vmatprep.subr.bf16.mxu0 %v2205_v59 }
  0x77   :  { %vm592_vm7 = vcmp.lt.s32.totalorder %v2916_v48, 16 }
  0x79   :  { %2208 = vmatpush3.bf16.msra.mxu0 %v2205_v59  ;;  %v2269_v59 = vpack.c.bf16 %v480_v58, %v479_v57  ;;  %v786_v57 = vld [vmem:[#allocation7 + $0xc0] sm:$0xff]  ;;  %v787_v58 = vld [vmem:[#allocation7 + $0xc8] sm:$0xff] }
  0x7a   :  { %2210 = vmatprep.subr.bf16.mxu0 %v2209_v63 }
  0x7d   :  { %2212 = vmatpush3.bf16.msra.mxu0 %v2209_v63  ;;  %v483_v63 = vld [vmem:[#allocation5 + $0x1d0] sm:$0xff] }
  0x7e   :  { %2214 = vmatprep.subr.bf16.mxu0 %v2213_v3  ;;  %v2277_v2 = vpack.c.bf16 %v484_v0, %v483_v63  ;;  %v790_v63 = vld [vmem:[#allocation7 + $0xe0] sm:$0xff]  ;;  %v791_v0 = vld [vmem:[#allocation7 + $0xe8] sm:$0xff] }
  0x81   :  { %2216 = vmatpush3.bf16.msra.mxu0 %v2213_v3  ;;  %v485_v3 = vld [vmem:[#allocation5 + $0x1e0] sm:$0xff] }
  0x82   :  { %2218 = vmatprep.subr.bf16.mxu0 %v2217_v6  ;;  %v2281_v5 = vpack.c.bf16 %v486_v4, %v485_v3  ;;  %v792_v3 = vld [vmem:[#allocation7 + $0xf0] sm:$0xff]  ;;  %v793_v4 = vld [vmem:[#allocation7 + $0xf8] sm:$0xff] }
  0x85   :  { %2220 = vmatpush3.bf16.msra.mxu0 %v2217_v6  ;;  %v487_v6 = vld [vmem:[#allocation5 + $0x1f0] sm:$0xff] }
  0x86   :  { %2222 = vmatprep.subr.bf16.mxu0 %v2221_v9 }
  0x89   :  { %2224 = vmatpush3.bf16.msra.mxu0 %v2221_v9  ;;  %v2285_v9 = vpack.c.bf16 %v488_v7, %v487_v6  ;;  %v749_v6 = vld [vmem:[#allocation7] sm:$0xff]  ;;  %v750_v7 = vld [vmem:[#allocation7 + $0x8] sm:$0xff] }
  0x8a   :  { %2226 = vmatprep.subr.bf16.mxu0 %v2225_v16 }
  0x8c   :  { %1814 = vmatmul.mubr.f32.vlgmr.msra.gmra.mrb[0].mxu0 %v95_v20  ;;  %v607_v20 = vld [vmem:[#allocation5 + $0x218] sm:$0xff] }
  0x8d   :  { %2228 = vmatpush3.bf16.msra.mxu0 %v2225_v16  ;;  %1816 = vmatprep.mubr.msk.f32.mxu0 %vm99_vm3, %v94_v22  ;;  %v2894_v16 = vadd.s32 1, %v82_v8  ;;  %v2293_v22 = vpack.c.bf16 %v607_v20, %v606_v19  ;;  %v2353_v8 = vpack.c.bf16 %v750_v7, %v749_v6  ;;  %v759_v7 = vld [vmem:[#allocation7 + $0x50] sm:$0xff] }
  0x8e   :  { %2230 = vmatprep.subr.bf16.mxu0 %v2229_v21 }
  0x8f   :  { %vm461_vm5 = vcmp.lt.s32.totalorder %v2894_v16, 16  ;;  %v1214_v16 = vld [vmem:[#allocation7 + $0x268] sm:$0xff] }
  0x90   :  { %1817 = vmatmul.mubr.f32.gmra.mrb[2].mxu0 %v93_v25  ;;  %v579_v25 = vrot.slane %v2842_v32, 2 }
  0x91   :  { %2232 = vmatpush3.bf16.msra.mxu0 %v2229_v21  ;;  %1851 = vmatprep.mubr.f32.mxu0 %v2830_v12  ;;  %v453_v21 = vsel %vm451_vm4, %v448_v52, %v449_v15  ;;  %v2305_v12 = vpack.c.bf16 %v613_v36, %v612_v34  ;;  %v783_v52 = vld [vmem:[#allocation7 + $0xa8] sm:$0xff] }
  0x92   :  { %2234 = vmatprep.subr.bf16.mxu0 %v2233_v26  ;;  %v585_v30 = vsel %vm582_vm6, %v578_v24, %v579_v25 }
  0x95   :  { %2236 = vmatpush3.bf16.msra.mxu0 %v2233_v26  ;;  %v608_v26 = vld [vmem:[#allocation5 + $0x220] sm:$0xff] }
  0x96   :  { %2238 = vmatprep.subr.bf16.mxu0 %v2237_v29 }
  0x99   :  { %2240 = vmatpush3.bf16.msra.mxu0 %v2237_v29  ;;  %v2297_v29 = vpack.c.bf16 %v609_v27, %v608_v26 }
  0x9a   :  { %2242 = vmatprep.subr.bf16.mxu0 %v2241_v33 }
  0x9d   :  { %2244 = vmatpush3.bf16.msra.mxu0 %v2241_v33 }
  0x9e   :  { %2246 = vmatprep.subr.bf16.mxu0 %v2245_v37 }
  0xa1   :  { %2248 = vmatpush3.bf16.msra.mxu0 %v2245_v37  ;;  %v614_v37 = vld [vmem:[#allocation5 + $0x250] sm:$0xff] }
  0xa2   :  { %2250 = vmatprep.subr.bf16.mxu0 %v2249_v40  ;;  %v2309_v39 = vpack.c.bf16 %v615_v38, %v614_v37 }
  0xa5   :  { %2252 = vmatpush3.bf16.msra.mxu0 %v2249_v40  ;;  %v616_v40 = vld [vmem:[#allocation5 + $0x260] sm:$0xff] }
  0xa6   :  { %2254 = vmatprep.subr.bf16.mxu0 %v2253_v44  ;;  %v2313_v43 = vpack.c.bf16 %v617_v41, %v616_v40 }
  0xa9   :  { %2256 = vmatpush3.bf16.msra.mxu0 %v2253_v44  ;;  %v618_v44 = vld [vmem:[#allocation5 + $0x270] sm:$0xff] }
  0xaa   :  { %2258 = vmatprep.subr.bf16.mxu0 %v2257_v47  ;;  %v2317_v46 = vpack.c.bf16 %v619_v45, %v618_v44  ;;  %v751_v45 = vld [vmem:[#allocation7 + $0x10] sm:$0xff] }
  0xac   :  { %1852 = vmatmul.mubr.f32.vlgmr.msra.gmra.mrb[0].mxu0 %v2842_v32  ;;  %v610_v32 = vld [vmem:[#allocation5 + $0x230] sm:$0xff] }
  0xad   :  { %2260 = vmatpush3.bf16.msra.mxu0 %v2257_v47  ;;  %1854 = vmatprep.mubr.f32.mxu0 %v2844_v35  ;;  %v2301_v33 = vpack.c.bf16 %v611_v31, %v610_v32  ;;  %v580_v47 = vrot.slane %v2844_v35, 2  ;;  %v586_v35 = vsel %vm582_vm6, %v581_v49, %v578_v24 }
  0xae   :  { %2262 = vmatprep.subr.bf16.mxu0 %v2261_v50 }
  0xaf   :  { %v583_v51 = vsel %vm582_vm6, %v580_v47, %v581_v49 }
  0xb0   :  { %1855 = vmatmul.mubr.f32.gmra.mrb[2].mxu0 %v2832_v13  ;;  %v782_v13 = vld [vmem:[#allocation7 + $0xa0] sm:$0xff] }
  0xb1   :  { %2264 = vmatpush3.bf16.msra.mxu0 %v2261_v50  ;;  %1889 = vmatprep.mubr.f32.mxu0 %v454_v56  ;;  %v584_v50 = vsel %vm582_vm6, %v579_v25, %v580_v47  ;;  %v2329_v53 = vpack.c.bf16 %v783_v52, %v782_v13  ;;  %v753_v52 = vld [vmem:[#allocation7 + $0x20] sm:$0xff] }
  0xb2   :  { %2266 = vmatprep.subr.bf16.mxu0 %v2265_v55 }
  0xb3   :  { %2330 = vmatprep.subr.bf16.mxu1 %v2329_v53 }
  0xb4   :  { %2332 = vmatpush3.bf16.msra.mxu1 %v2329_v53  ;;  %v754_v53 = vld [vmem:[#allocation7 + $0x28] sm:$0xff] }
  0xb5   :  { %2268 = vmatpush3.bf16.msra.mxu0 %v2265_v55  ;;  %v785_v55 = vld [vmem:[#allocation7 + $0xb8] sm:$0xff] }
  0xb6   :  { %2270 = vmatprep.subr.bf16.mxu0 %v2269_v59  ;;  %v2333_v56 = vpack.c.bf16 %v785_v55, %v784_v54 }
  0xb8   :  { %2334 = vmatprep.subr.bf16.mxu1 %v2333_v56 }
  0xb9   :  { %2272 = vmatpush3.bf16.msra.mxu0 %v2269_v59  ;;  %2336 = vmatpush3.bf16.msra.mxu1 %v2333_v56  ;;  %v2337_v59 = vpack.c.bf16 %v787_v58, %v786_v57  ;;  %v2361_v56 = vpack.c.bf16 %v754_v53, %v753_v52  ;;  %v755_v58 = vld [vmem:[#allocation7 + $0x30] sm:$0xff]  ;;  %v1083_v52 = vld [vmem:[#allocation7 + $0x180] sm:$0xff]  ;;  %v1084_v53 = vld [vmem:[#allocation7 + $0x188] sm:$0xff] }
  0xba   :  { %2274 = vmatprep.subr.bf16.mxu0 %v2273_v62 }
  0xbb   :  { %2338 = vmatprep.subr.bf16.mxu1 %v2337_v59 }
  0xbd   :  { %2276 = vmatpush3.bf16.msra.mxu0 %v2273_v62  ;;  %2340 = vmatpush3.bf16.msra.mxu1 %v2337_v59  ;;  %v2341_v62 = vpack.c.bf16 %v789_v61, %v788_v60  ;;  %v756_v59 = vld [vmem:[#allocation7 + $0x38] sm:$0xff]  ;;  %v1338_v61 = vld [vmem:[#allocation8] sm:$0xff] }
  0xbe   :  { %2278 = vmatprep.subr.bf16.mxu0 %v2277_v2 }
  0xbf   :  { %2342 = vmatprep.subr.bf16.mxu1 %v2341_v62 }
  0xc1   :  { %2280 = vmatpush3.bf16.msra.mxu0 %v2277_v2  ;;  %2344 = vmatpush3.bf16.msra.mxu1 %v2341_v62  ;;  %v2345_v2 = vpack.c.bf16 %v791_v0, %v790_v63  ;;  %v1339_v62 = vld [vmem:[#allocation8 + $0x8] sm:$0xff]  ;;  %v1340_v63 = vld [vmem:[#allocation8 + $0x10] sm:$0xff]  ;;  %v1341_v0 = vld [vmem:[#allocation8 + $0x18] sm:$0xff] }
  0xc2   :  { %2282 = vmatprep.subr.bf16.mxu0 %v2281_v5  ;;  %v2965_v10 = vpack.c.bf16 %v1339_v62, %v1338_v61 }
  0xc3   :  { %2346 = vmatprep.subr.bf16.mxu1 %v2345_v2 }
  0xc5   :  { %2284 = vmatpush3.bf16.msra.mxu0 %v2281_v5  ;;  %2348 = vmatpush3.bf16.msra.mxu1 %v2345_v2  ;;  %v2349_v5 = vpack.c.bf16 %v793_v4, %v792_v3  ;;  %v2365_v2 = vpack.c.bf16 %v756_v59, %v755_v58  ;;  %v2967_v3 = vpack.c.bf16 %v1341_v0, %v1340_v63  ;;  %v757_v4 = vld [vmem:[#allocation7 + $0x40] sm:$0xff]  ;;  %v1088_v59 = vld [vmem:[#allocation7 + $0x1a8] sm:$0xff]  ;;  %v1089_v63 = vld [vmem:[#allocation7 + $0x1b0] sm:$0xff] }
  0xc6   :  { %2286 = vmatprep.subr.bf16.mxu0 %v2285_v9  ;;  %v1087_v58 = vld [vmem:[#allocation7 + $0x1a0] sm:$0xff]  ;;  %v1090_v0 = vld [vmem:[#allocation7 + $0x1b8] sm:$0xff] }
  0xc7   :  { %2350 = vmatprep.subr.bf16.mxu1 %v2349_v5  ;;  %v2425_v62 = vpack.c.bf16 %v1088_v59, %v1087_v58  ;;  %v1344_v59 = vld [vmem:[#allocation8 + $0x30] sm:$0xff] }
  0xc9   :  { %2288 = vmatpush3.bf16.msra.mxu0 %v2285_v9  ;;  %2352 = vmatpush3.bf16.msra.mxu1 %v2349_v5  ;;  %v1510_v9 = vld [vmem:[%s3056_s4] ss:$0 sm:$0xff]  ;;  %v758_v5 = vld [vmem:[#allocation7 + $0x48] sm:$0xff] }
  0xca   :  { %2290 = vmatprep.subr.bf16.mxu0 %v2289_v17  ;;  %2354 = vmatprep.subr.bf16.mxu1 %v2353_v8  ;;  %v2369_v6 = vpack.c.bf16 %v758_v5, %v757_v4  ;;  %v2429_v4 = vpack.c.bf16 %v1090_v0, %v1089_v63  ;;  %v1091_v5 = vld [vmem:[#allocation7 + $0x1c0] sm:$0xff] }
  0xcb   :  { %v1350_v0 = vld [vmem:[#allocation8 + $0x60] sm:$0xff] }
  0xcc   :  { %1890 = vmatmul.mubr.msk.f32.vlgmr.msra.gmra.mrb[0].mxu0 %vm461_vm5, %v453_v21 }
  0xcd   :  { %2292 = vmatpush3.bf16.msra.mxu0 %v2289_v17  ;;  %1892 = vmatprep.mubr.f32.mxu0 %v452_v23 }
  0xce   :  { %2294 = vmatprep.subr.bf16.mxu0 %v2293_v22 }
  0xd0   :  { %1893 = vmatmul.mubr.msk.f32.gmra.mrb[2].mxu0 %vm461_vm5, %v455_v28 }
  0xd1   :  { %2296 = vmatpush3.bf16.msra.mxu0 %v2293_v22  ;;  %1927 = vmatprep.mubr.f32.mxu0 %v585_v30 }
  0xd2   :  { %2298 = vmatprep.subr.bf16.mxu0 %v2297_v29 }
  0xd5   :  { %2300 = vmatpush3.bf16.msra.mxu0 %v2297_v29 }
  0xd6   :  { %2302 = vmatprep.subr.bf16.mxu0 %v2301_v33 }
  0xd9   :  { %2304 = vmatpush3.bf16.msra.mxu0 %v2301_v33 }
  0xda   :  { %2306 = vmatprep.subr.bf16.mxu0 %v2305_v12 }
  0xdd   :  { %2308 = vmatpush3.bf16.msra.mxu0 %v2305_v12 }
  0xde   :  { %2310 = vmatprep.subr.bf16.mxu0 %v2309_v39 }
  0xe1   :  { %2312 = vmatpush3.bf16.msra.mxu0 %v2309_v39 }
  0xe2   :  { %2314 = vmatprep.subr.bf16.mxu0 %v2313_v43 }
  0xe5   :  { %2316 = vmatpush3.bf16.msra.mxu0 %v2313_v43 }
  0xe6   :  { %2318 = vmatprep.subr.bf16.mxu0 %v2317_v46 }
  0xe9   :  { %2320 = vmatpush3.bf16.msra.mxu0 %v2317_v46  ;;  %v752_v46 = vld [vmem:[#allocation7 + $0x18] sm:$0xff] }
  0xea   :  { %2482 = vmatprep.subr.bf16.mxu0 %v2965_v10 }
  0xec   :  { %1928 = vmatmul.mubr.msk.f32.vlgmr.msra.gmra.mrb[0].mxu0 %vm592_vm7, %v584_v50 }
  0xed   :  { %1930 = vmatprep.mubr.f32.mxu0 %v583_v51  ;;  %v2357_v51 = vpack.c.bf16 %v752_v46, %v751_v45  ;;  %2484 = vmatpush3.bf16.msra.mxu0 %v2965_v10  ;;  %v976_v45 = vld [vmem:[#allocation7 + $0x158] sm:$0xff] }
  0xee   :  { %2486 = vmatprep.subr.bf16.mxu0 %v2967_v3 }
  0xf0   :  { %1931 = vmatmul.mubr.msk.f32.gmra.mrb[2].mxu0 %vm592_vm7, %v586_v35 }
  0xf1   :  { %2488 = vmatpush3.bf16.msra.mxu0 %v2967_v3 }
 0x1bf   :  { %v1929_v11 = vpop.f32.mrb[0].mxu0 }
 0x1c0   :  { %v714_v14 = vadd.f32 %v1929_v11, %v1510_v9  ;;  %v686_v15 = vpop.f32.mrb[1].mxu0  ;;  %v761_v11 = vld [vmem:[#allocation7 + $0x60] sm:$0xff] }
 0x1c1   :  { %v713_v17 = vadd.f32 %v1510_v9, %v686_v15 }
 0x1c2   :  { %v722_v18 = vmul.f32 0.70710677, %v714_v14  ;;  %v718_v29 = vmul.f32 0.5, %v714_v14  ;;  %v762_v14 = vld [vmem:[#allocation7 + $0x68] sm:$0xff] }
 0x1c3   :  { %v721_v19 = vmul.f32 0.70710677, %v713_v17  ;;  %v1932_v20 = vpop.f32.mrb[2].mxu0  ;;  %v717_v30 = vmul.f32 0.5, %v713_v17  ;;  %v2377_v15 = vpack.c.bf16 %v762_v14, %v761_v11  ;;  %v763_v17 = vld [vmem:[#allocation7 + $0x70] sm:$0xff]  ;;  %v1095_v14 = vld [vmem:[#allocation7 + $0x1e0] sm:$0xff] }
 0x1c4   :  { %2568 = verf.f32 %v722_v18  ;;  %v716_v21 = vadd.f32 %v1932_v20, %v1510_v9  ;;  %v696_v22 = vpop.f32.mrb[3].mxu0  ;;  %v764_v18 = vld [vmem:[#allocation7 + $0x78] sm:$0xff]  ;;  %v965_v20 = vld [vmem:[#allocation7 + $0x100] sm:$0xff] }
 0x1c5   :  { %2570 = verf.f32 %v721_v19  ;;  %v715_v23 = vadd.f32 %v1510_v9, %v696_v22  ;;  %v2381_v19 = vpack.c.bf16 %v764_v18, %v763_v17  ;;  %v1097_v18 = vld [vmem:[#allocation7 + $0x1f0] sm:$0xff] }
 0x1c6   :  { %v724_v24 = vmul.f32 0.70710677, %v716_v21  ;;  %v720_v12 = vmul.f32 0.5, %v716_v21  ;;  %v966_v21 = vld [vmem:[#allocation7 + $0x108] sm:$0xff] }
 0x1c7   :  { %v723_v25 = vmul.f32 0.70710677, %v715_v23  ;;  %v719_v38 = vmul.f32 0.5, %v715_v23  ;;  %v2385_v22 = vpack.c.bf16 %v966_v21, %v965_v20  ;;  %v1201_v21 = vld [vmem:[#allocation7 + $0x200] sm:$0xff] }
 0x1c8   :  { %2572 = verf.f32 %v724_v24  ;;  %v967_v24 = vld [vmem:[#allocation7 + $0x110] sm:$0xff] }
 0x1c9   :  { %2574 = verf.f32 %v723_v25  ;;  %v968_v25 = vld [vmem:[#allocation7 + $0x118] sm:$0xff] }
 0x1ce   :  { %v2569_v26 = vpop.eup %2568 }
 0x1cf   :  { %v2571_v27 = vpop.eup %2570  ;;  %v730_v28 = vadd.f32 1.0, %v2569_v26 }
 0x1d0   :  { %v729_v32 = vadd.f32 1.0, %v2571_v27  ;;  %v2389_v27 = vpack.c.bf16 %v968_v25, %v967_v24  ;;  %v1203_v25 = vld [vmem:[#allocation7 + $0x210] sm:$0xff] }
 0x1d1   :  { %v2933_v33 = vmul.f32 %v730_v28, %v718_v29  ;;  %v969_v29 = vld [vmem:[#allocation7 + $0x120] sm:$0xff] }
 0x1d2   :  { %v2573_v31 = vpop.eup %2572  ;;  %v2935_v34 = vmul.f32 %v729_v32, %v717_v30  ;;  %v970_v30 = vld [vmem:[#allocation7 + $0x128] sm:$0xff] }
 0x1d3   :  { %v2575_v36 = vpop.eup %2574  ;;  %v732_v37 = vadd.f32 1.0, %v2573_v31  ;;  %v766_v44 = vrot.slane %v2933_v33, 7  ;;  %v738_v23 = vrot.slane %v2933_v33, 6  ;;  %v2393_v31 = vpack.c.bf16 %v970_v30, %v969_v29  ;;  %v1205_v30 = vld [vmem:[#allocation7 + $0x220] sm:$0xff] }
 0x1d4   :  { %v731_v39 = vadd.f32 1.0, %v2575_v36  ;;  %v765_v43 = vrot.slane %v2935_v34, 7  ;;  %v737_v55 = vrot.slane %v2935_v34, 6  ;;  %v1071_v61 = vrot.slane %v2933_v33, 1 }
 0x1d5   :  { %v2937_v40 = vmul.f32 %v732_v37, %v720_v12  ;;  %v971_v12 = vld [vmem:[#allocation7 + $0x130] sm:$0xff]  ;;  %v972_v37 = vld [vmem:[#allocation7 + $0x138] sm:$0xff] }
 0x1d6   :  { %v2939_v41 = vmul.f32 %v731_v39, %v719_v38  ;;  %v771_v35 = vsel %vm133_vm0, %v765_v43, %v766_v44  ;;  %v743_v28 = vsel %vm92_vm2, %v737_v55, %v738_v23  ;;  %v2397_v38 = vpack.c.bf16 %v972_v37, %v971_v12  ;;  %v973_v39 = vld [vmem:[#allocation7 + $0x140] sm:$0xff] }
 0x1d7   :  { %v768_v47 = vrot.slane %v2937_v40, 7  ;;  %v740_v54 = vrot.slane %v2937_v40, 6  ;;  %v1189_v12 = vrot.slane %v2933_v33, 2 }
 0x1d8   :  { %v767_v49 = vrot.slane %v2939_v41, 7  ;;  %v739_v26 = vrot.slane %v2939_v41, 6  ;;  %v1072_v24 = vrot.slane %v2939_v41, 1 }
 0x1d9   :  { %v772_v50 = vsel %vm133_vm0, %v768_v47, %v765_v43  ;;  %v744_v60 = vsel %vm92_vm2, %v740_v54, %v737_v55  ;;  %v974_v43 = vld [vmem:[#allocation7 + $0x148] sm:$0xff]  ;;  %v1085_v55 = vld [vmem:[#allocation7 + $0x190] sm:$0xff] }
 0x1da   :  { %1965 = vmatprep.mubr.msk.f32.mxu1 %vm140_vm1, %v772_v50  ;;  %v770_v13 = vsel %vm133_vm0, %v766_v44, %v767_v49  ;;  %v769_v57 = vsel %vm133_vm0, %v767_v49, %v768_v47  ;;  %v742_v32 = vsel %vm92_vm2, %v738_v23, %v739_v26  ;;  %v741_v36 = vsel %vm92_vm2, %v739_v26, %v740_v54  ;;  %v975_v44 = vld [vmem:[#allocation7 + $0x150] sm:$0xff]  ;;  %v977_v47 = vld [vmem:[#allocation7 + $0x160] sm:$0xff]  ;;  %v978_v49 = vld [vmem:[#allocation7 + $0x168] sm:$0xff] }
 0x1db   :  { %1966 = vmatmul.mubr.f32.vlgmr.msra.gmra.mrb[0].mxu1 %v771_v35  ;;  %v2401_v42 = vpack.c.bf16 %v974_v43, %v973_v39  ;;  %v2405_v46 = vpack.c.bf16 %v976_v45, %v975_v44  ;;  %v2409_v50 = vpack.c.bf16 %v978_v49, %v977_v47  ;;  %v980_v35 = vld [vmem:[#allocation7 + $0x178] sm:$0xff]  ;;  %v2417_v54 = vpack.c.bf16 %v1084_v53, %v1083_v52  ;;  %v1207_v39 = vld [vmem:[#allocation7 + $0x230] sm:$0xff]  ;;  %v1210_v44 = vld [vmem:[#allocation7 + $0x248] sm:$0xff] }
 0x1dc   :  { %2356 = vmatpush3.bf16.msra.mxu1 %v2353_v8  ;;  %1968 = vmatprep.mubr.msk.f32.mxu1 %vm140_vm1, %v770_v13  ;;  %v760_v8 = vld [vmem:[#allocation7 + $0x58] sm:$0xff]  ;;  %v1075_v29 = vsel %vm451_vm4, %v1071_v61, %v1072_v24  ;;  %v1190_v53 = vrot.slane %v2939_v41, 2 }
 0x1dd   :  { %2358 = vmatprep.subr.bf16.mxu1 %v2357_v51  ;;  %v2373_v9 = vpack.c.bf16 %v760_v8, %v759_v7  ;;  %v1093_v8 = vld [vmem:[#allocation7 + $0x1d0] sm:$0xff]  ;;  %v1204_v26 = vld [vmem:[#allocation7 + $0x218] sm:$0xff] }
 0x1de   :  { %v1208_v43 = vld [vmem:[#allocation7 + $0x238] sm:$0xff] }
 0x1df   :  { %1969 = vmatmul.mubr.f32.gmra.mrb[2].mxu1 %v769_v57  ;;  %v1212_v47 = vld [vmem:[#allocation7 + $0x258] sm:$0xff] }
 0x1e0   :  { %2360 = vmatpush3.bf16.msra.mxu1 %v2357_v51  ;;  %2003 = vmatprep.mubr.msk.f32.mxu1 %vm99_vm3, %v744_v60  ;;  %v979_v51 = vld [vmem:[#allocation7 + $0x170] sm:$0xff]  ;;  %v1070_v60 = vrot.slane %v2935_v34, 1 }
 0x1e1   :  { %2362 = vmatprep.subr.bf16.mxu1 %v2361_v56  ;;  %v2413_v13 = vpack.c.bf16 %v980_v35, %v979_v51  ;;  %v1215_v35 = vld [vmem:[#allocation7 + $0x270] sm:$0xff] }
 0x1e4   :  { %2364 = vmatpush3.bf16.msra.mxu1 %v2361_v56  ;;  %v1086_v56 = vld [vmem:[#allocation7 + $0x198] sm:$0xff] }
 0x1e5   :  { %2366 = vmatprep.subr.bf16.mxu1 %v2365_v2  ;;  %v2421_v57 = vpack.c.bf16 %v1086_v56, %v1085_v55  ;;  %v1193_v55 = vsel %vm582_vm6, %v1189_v12, %v1190_v53 }
 0x1e8   :  { %2368 = vmatpush3.bf16.msra.mxu1 %v2365_v2  ;;  %v1076_v2 = vsel %vm451_vm4, %v1070_v60, %v1071_v61  ;;  %v1347_v61 = vld [vmem:[#allocation8 + $0x48] sm:$0xff] }
 0x1e9   :  { %2370 = vmatprep.subr.bf16.mxu1 %v2369_v6  ;;  %v2497_v48 = vpack.c.bf16 %v1347_v61, %v1346_v1 }
 0x1ec   :  { %2372 = vmatpush3.bf16.msra.mxu1 %v2369_v6  ;;  %v1092_v6 = vld [vmem:[#allocation7 + $0x1c8] sm:$0xff] }
 0x1ed   :  { %2374 = vmatprep.subr.bf16.mxu1 %v2373_v9  ;;  %v2433_v7 = vpack.c.bf16 %v1092_v6, %v1091_v5  ;;  %v1352_v5 = vld [vmem:[#allocation8 + $0x70] sm:$0xff]  ;;  %v1353_v6 = vld [vmem:[#allocation8 + $0x78] sm:$0xff] }
 0x1f0   :  { %2376 = vmatpush3.bf16.msra.mxu1 %v2373_v9  ;;  %v1094_v9 = vld [vmem:[#allocation7 + $0x1d8] sm:$0xff] }
 0x1f1   :  { %2378 = vmatprep.subr.bf16.mxu1 %v2377_v15  ;;  %v2437_v11 = vpack.c.bf16 %v1094_v9, %v1093_v8  ;;  %v1519_v8 = vld [vmem:[%s3056_s4 + $0x1] ss:$0 sm:$0xff] }
 0x1f4   :  { %2380 = vmatpush3.bf16.msra.mxu1 %v2377_v15  ;;  %v1096_v15 = vld [vmem:[#allocation7 + $0x1e8] sm:$0xff] }
 0x1f5   :  { %2382 = vmatprep.subr.bf16.mxu1 %v2381_v19  ;;  %v2441_v17 = vpack.c.bf16 %v1096_v15, %v1095_v14 }
 0x1f8   :  { %2384 = vmatpush3.bf16.msra.mxu1 %v2381_v19  ;;  %v1098_v19 = vld [vmem:[#allocation7 + $0x1f8] sm:$0xff] }
 0x1f9   :  { %2386 = vmatprep.subr.bf16.mxu1 %v2385_v22  ;;  %v2445_v20 = vpack.c.bf16 %v1098_v19, %v1097_v18 }
 0x1fb   :  { %2004 = vmatmul.mubr.f32.vlgmr.msra.gmra.mrb[0].mxu1 %v743_v28  ;;  %v2453_v28 = vpack.c.bf16 %v1204_v26, %v1203_v25 }
 0x1fc   :  { %2006 = vmatprep.mubr.msk.f32.mxu1 %vm99_vm3, %v742_v32  ;;  %2388 = vmatpush3.bf16.msra.mxu1 %v2385_v22  ;;  %v1202_v22 = vld [vmem:[#allocation7 + $0x208] sm:$0xff] }
 0x1fd   :  { %2390 = vmatprep.subr.bf16.mxu1 %v2389_v27  ;;  %v2449_v23 = vpack.c.bf16 %v1202_v22, %v1201_v21  ;;  %v1206_v32 = vld [vmem:[#allocation7 + $0x228] sm:$0xff] }
 0x1fe   :  { %v2457_v37 = vpack.c.bf16 %v1206_v32, %v1205_v30 }
 0x1ff   :  { %2007 = vmatmul.mubr.f32.gmra.mrb[2].mxu1 %v741_v36  ;;  %v1188_v36 = vrot.slane %v2935_v34, 2 }
 0x200   :  { %2392 = vmatpush3.bf16.msra.mxu1 %v2389_v27  ;;  %2041 = vmatprep.mubr.f32.mxu1 %v2935_v34  ;;  %v1073_v27 = vrot.slane %v2937_v40, 1  ;;  %v2461_v34 = vpack.c.bf16 %v1208_v43, %v1207_v39 }
 0x201   :  { %2394 = vmatprep.subr.bf16.mxu1 %v2393_v31 }
 0x204   :  { %2396 = vmatpush3.bf16.msra.mxu1 %v2393_v31  ;;  %v1074_v31 = vsel %vm451_vm4, %v1072_v24, %v1073_v27 }
 0x205   :  { %2398 = vmatprep.subr.bf16.mxu1 %v2397_v38 }
 0x208   :  { %2400 = vmatpush3.bf16.msra.mxu1 %v2397_v38  ;;  %v1077_v38 = vsel %vm451_vm4, %v1073_v27, %v1070_v60  ;;  %v1345_v60 = vld [vmem:[#allocation8 + $0x38] sm:$0xff] }
 0x209   :  { %2402 = vmatprep.subr.bf16.mxu1 %v2401_v42 }
 0x20c   :  { %2404 = vmatpush3.bf16.msra.mxu1 %v2401_v42  ;;  %v1194_v42 = vsel %vm582_vm6, %v1188_v36, %v1189_v12 }
 0x20d   :  { %2406 = vmatprep.subr.bf16.mxu1 %v2405_v46 }
 0x210   :  { %2408 = vmatpush3.bf16.msra.mxu1 %v2405_v46  ;;  %v1211_v46 = vld [vmem:[#allocation7 + $0x250] sm:$0xff] }
 0x211   :  { %2410 = vmatprep.subr.bf16.mxu1 %v2409_v50  ;;  %v2469_v49 = vpack.c.bf16 %v1212_v47, %v1211_v46  ;;  %v2594_v47 = vld [vmem:[#allocation2 + $0x10] sm:$0xff] }
 0x214   :  { %2412 = vmatpush3.bf16.msra.mxu1 %v2409_v50  ;;  %v1213_v50 = vld [vmem:[#allocation7 + $0x260] sm:$0xff] }
 0x215   :  { %2414 = vmatprep.subr.bf16.mxu1 %v2413_v13  ;;  %v2473_v51 = vpack.c.bf16 %v1214_v16, %v1213_v50  ;;  %v2595_v50 = vld [vmem:[#allocation2 + $0x18] sm:$0xff] }
 0x218   :  { %2416 = vmatpush3.bf16.msra.mxu1 %v2413_v13  ;;  %v1216_v13 = vld [vmem:[#allocation7 + $0x278] sm:$0xff] }
 0x219   :  { %2418 = vmatprep.subr.bf16.mxu1 %v2417_v54  ;;  %v2477_v52 = vpack.c.bf16 %v1216_v13, %v1215_v35 }
 0x21b   :  { %2042 = vmatmul.mubr.f32.vlgmr.msra.gmra.mrb[0].mxu1 %v2933_v33  ;;  %v1209_v33 = vld [vmem:[#allocation7 + $0x240] sm:$0xff] }
 0x21c   :  { %2044 = vmatprep.mubr.f32.mxu1 %v2939_v41  ;;  %2420 = vmatpush3.bf16.msra.mxu1 %v2417_v54  ;;  %v2465_v45 = vpack.c.bf16 %v1210_v44, %v1209_v33  ;;  %v1191_v54 = vrot.slane %v2937_v40, 2  ;;  %v1342_v41 = vld [vmem:[#allocation8 + $0x20] sm:$0xff]  ;;  %v2593_v33 = vld [vmem:[#allocation2 + $0x8] sm:$0xff] }
 0x21d   :  { %2422 = vmatprep.subr.bf16.mxu1 %v2421_v57 }
 0x21e   :  { %v1192_v56 = vsel %vm582_vm6, %v1190_v53, %v1191_v54 }
 0x21f   :  { %2045 = vmatmul.mubr.f32.gmra.mrb[2].mxu1 %v2937_v40  ;;  %v1195_v40 = vsel %vm582_vm6, %v1191_v54, %v1188_v36 }
 0x220   :  { %2424 = vmatpush3.bf16.msra.mxu1 %v2421_v57  ;;  %2079 = vmatprep.mubr.f32.mxu1 %v1076_v2  ;;  %v1343_v57 = vld [vmem:[#allocation8 + $0x28] sm:$0xff] }
 0x221   :  { %2426 = vmatprep.subr.bf16.mxu1 %v2425_v62  ;;  %v2489_v58 = vpack.c.bf16 %v1343_v57, %v1342_v41  ;;  %v1351_v2 = vld [vmem:[#allocation8 + $0x68] sm:$0xff] }
 0x223   :  { %2490 = vmatprep.subr.bf16.mxu0 %v2489_v58 }
 0x224   :  { %2428 = vmatpush3.bf16.msra.mxu1 %v2425_v62  ;;  %2492 = vmatpush3.bf16.msra.mxu0 %v2489_v58  ;;  %v1349_v62 = vld [vmem:[#allocation8 + $0x58] sm:$0xff] }
 0x225   :  { %2430 = vmatprep.subr.bf16.mxu1 %v2429_v4 }
 0x228   :  { %2432 = vmatpush3.bf16.msra.mxu1 %v2429_v4  ;;  %v2505_v4 = vpack.c.bf16 %v1351_v2, %v1350_v0  ;;  %v1522_v2 = vld [vmem:[%s3056_s4 + $0x4] ss:$0 sm:$0xff] }
 0x229   :  { %2434 = vmatprep.subr.bf16.mxu1 %v2433_v7 }
 0x22c   :  { %2436 = vmatpush3.bf16.msra.mxu1 %v2433_v7  ;;  %v2509_v7 = vpack.c.bf16 %v1353_v6, %v1352_v5 }
 0x22d   :  { %2438 = vmatprep.subr.bf16.mxu1 %v2437_v11 }
 0x230   :  { %2440 = vmatpush3.bf16.msra.mxu1 %v2437_v11 }
 0x231   :  { %2442 = vmatprep.subr.bf16.mxu1 %v2441_v17 }
 0x234   :  { %2444 = vmatpush3.bf16.msra.mxu1 %v2441_v17 }
 0x235   :  { %2446 = vmatprep.subr.bf16.mxu1 %v2445_v20 }
 0x238   :  { %2448 = vmatpush3.bf16.msra.mxu1 %v2445_v20 }
 0x239   :  { %2450 = vmatprep.subr.bf16.mxu1 %v2449_v23 }
 0x23b   :  { %2080 = vmatmul.mubr.msk.f32.vlgmr.msra.gmra.mrb[0].mxu1 %vm461_vm5, %v1075_v29 }
 0x23c   :  { %2082 = vmatprep.mubr.f32.mxu1 %v1074_v31  ;;  %2452 = vmatpush3.bf16.msra.mxu1 %v2449_v23 }
 0x23d   :  { %2454 = vmatprep.subr.bf16.mxu1 %v2453_v28 }
 0x23f   :  { %2083 = vmatmul.mubr.msk.f32.gmra.mrb[2].mxu1 %vm461_vm5, %v1077_v38 }
 0x240   :  { %2456 = vmatpush3.bf16.msra.mxu1 %v2453_v28  ;;  %2117 = vmatprep.mubr.f32.mxu1 %v1194_v42  ;;  %v2592_v42 = vld [vmem:[#allocation2] sm:$0xff] }
 0x241   :  { %2458 = vmatprep.subr.bf16.mxu1 %v2457_v37 }
 0x244   :  { %2460 = vmatpush3.bf16.msra.mxu1 %v2457_v37 }
 0x245   :  { %2462 = vmatprep.subr.bf16.mxu1 %v2461_v34 }
 0x248   :  { %2464 = vmatpush3.bf16.msra.mxu1 %v2461_v34 }
 0x249   :  { %2466 = vmatprep.subr.bf16.mxu1 %v2465_v45 }
 0x24c   :  { %2468 = vmatpush3.bf16.msra.mxu1 %v2465_v45 }
 0x24d   :  { %2470 = vmatprep.subr.bf16.mxu1 %v2469_v49 }
 0x250   :  { %2472 = vmatpush3.bf16.msra.mxu1 %v2469_v49 }
 0x251   :  { %2474 = vmatprep.subr.bf16.mxu1 %v2473_v51 }
 0x254   :  { %2476 = vmatpush3.bf16.msra.mxu1 %v2473_v51  ;;  %v1520_v51 = vld [vmem:[%s3056_s4 + $0x2] ss:$0 sm:$0xff] }
 0x255   :  { %2478 = vmatprep.subr.bf16.mxu1 %v2477_v52 }
 0x258   :  { %2480 = vmatpush3.bf16.msra.mxu1 %v2477_v52 }
 0x259   :  { %2513 = vmatprep.subr.bf16.mxu1 %v2965_v10 }
 0x25b   :  { %2118 = vmatmul.mubr.msk.f32.vlgmr.msra.gmra.mrb[0].mxu1 %vm592_vm7, %v1193_v55 }
 0x25c   :  { %2120 = vmatprep.mubr.f32.mxu1 %v1192_v56  ;;  %2521 = vmatpush3.bf16.msra.mxu1 %v2965_v10  ;;  %v2493_v10 = vpack.c.bf16 %v1345_v60, %v1344_v59 }
 0x25d   :  { %2514 = vmatprep.subr.bf16.mxu1 %v2967_v3 }
 0x25e   :  { %2494 = vmatprep.subr.bf16.mxu0 %v2493_v10 }
 0x25f   :  { %2121 = vmatmul.mubr.msk.f32.gmra.mrb[2].mxu1 %vm592_vm7, %v1195_v40  ;;  %2496 = vmatpush3.bf16.msra.mxu0 %v2493_v10 }
 0x260   :  { %2522 = vmatpush3.bf16.msra.mxu1 %v2967_v3  ;;  %2498 = vmatprep.subr.bf16.mxu0 %v2497_v48  ;;  %v1348_v3 = vld [vmem:[#allocation8 + $0x50] sm:$0xff] }
 0x261   :  { %2515 = vmatprep.subr.bf16.mxu1 %v2489_v58  ;;  %v2501_v63 = vpack.c.bf16 %v1349_v62, %v1348_v3 }
 0x263   :  { %2500 = vmatpush3.bf16.msra.mxu0 %v2497_v48 }
 0x264   :  { %2523 = vmatpush3.bf16.msra.mxu1 %v2489_v58  ;;  %2502 = vmatprep.subr.bf16.mxu0 %v2501_v63 }
 0x265   :  { %2516 = vmatprep.subr.bf16.mxu1 %v2493_v10 }
 0x267   :  { %2504 = vmatpush3.bf16.msra.mxu0 %v2501_v63 }
 0x268   :  { %2524 = vmatpush3.bf16.msra.mxu1 %v2493_v10  ;;  %2506 = vmatprep.subr.bf16.mxu0 %v2505_v4 }
 0x269   :  { %2517 = vmatprep.subr.bf16.mxu1 %v2497_v48 }
 0x26b   :  { %2508 = vmatpush3.bf16.msra.mxu0 %v2505_v4 }
 0x26c   :  { %2525 = vmatpush3.bf16.msra.mxu1 %v2497_v48  ;;  %2510 = vmatprep.subr.bf16.mxu0 %v2509_v7  ;;  %v1521_v48 = vld [vmem:[%s3056_s4 + $0x3] ss:$0 sm:$0xff]  ;;  %s2684_s4 = scalar_lea.vmem %s1489_s27, 512 }
 0x26d   :  { %2518 = vmatprep.subr.bf16.mxu1 %v2501_v63  ;;  %p2685_p4 = scmp.ne.s32.totalorder %s1489_s27, %s2684_s4  ;;  %p2690_p6 = scmp.lt.s32.totalorder %s2684_s4, %s2684_s4 }
 0x26f   :  { %2512 = vmatpush3.bf16.msra.mxu0 %v2509_v7  ;;  %p2691_p7 = por %p2690_p6, %p2689_p5 }
 0x270   :  { %2526 = vmatpush3.bf16.msra.mxu1 %v2501_v63 }
 0x271   :  { %2519 = vmatprep.subr.bf16.mxu1 %v2505_v4  ;;  %p2692_p8 = pnand %p2691_p7, %p2685_p4 }
 0x274   :  { %2527 = vmatpush3.bf16.msra.mxu1 %v2505_v4 }
 0x275   :  { %2520 = vmatprep.subr.bf16.mxu1 %v2509_v7 }
 0x278   :  { %2528 = vmatpush3.bf16.msra.mxu1 %v2509_v7 }
 0x32e   :  { %v2119_v9 = vpop.f32.mrb[0].mxu1 }
 0x32f   :  { %v1311_v11 = vadd.f32 %v2119_v9, %v1519_v8  ;;  %v1283_v14 = vpop.f32.mrb[1].mxu1 }
 0x330   :  { %v1310_v15 = vadd.f32 %v1519_v8, %v1283_v14 }
 0x331   :  { %v1319_v17 = vmul.f32 0.70710677, %v1311_v11  ;;  %v1315_v27 = vmul.f32 0.5, %v1311_v11 }
 0x332   :  { %v1318_v18 = vmul.f32 0.70710677, %v1310_v15  ;;  %v2122_v19 = vpop.f32.mrb[2].mxu1  ;;  %v1314_v29 = vmul.f32 0.5, %v1310_v15 }
 0x333   :  { %2576 = verf.f32 %v1319_v17  ;;  %v1313_v20 = vadd.f32 %v2122_v19, %v1519_v8  ;;  %v1293_v21 = vpop.f32.mrb[3].mxu1 }
 0x334   :  { %2578 = verf.f32 %v1318_v18  ;;  %v1312_v22 = vadd.f32 %v1519_v8, %v1293_v21 }
 0x335   :  { %v1321_v23 = vmul.f32 0.70710677, %v1313_v20  ;;  %v1317_v37 = vmul.f32 0.5, %v1313_v20 }
 0x336   :  { %v1320_v24 = vmul.f32 0.70710677, %v1312_v22  ;;  %v1316_v39 = vmul.f32 0.5, %v1312_v22 }
 0x337   :  { %2580 = verf.f32 %v1321_v23 }
 0x338   :  { %2582 = verf.f32 %v1320_v24 }
 0x33d   :  { %v2577_v25 = vpop.eup %2576 }
 0x33e   :  { %v2579_v26 = vpop.eup %2578  ;;  %v1327_v28 = vadd.f32 1.0, %v2577_v25 }
 0x33f   :  { %v1326_v30 = vadd.f32 1.0, %v2579_v26 }
 0x340   :  { %v1331_v32 = vmul.f32 %v1327_v28, %v1315_v27 }
 0x341   :  { %v2581_v31 = vpop.eup %2580  ;;  %v1330_v36 = vmul.f32 %v1326_v30, %v1314_v29 }
 0x342   :  { %v2583_v12 = vpop.eup %2582  ;;  %v1329_v38 = vadd.f32 1.0, %v2581_v31  ;;  %v1335_v44 = vadd.f32 %v2593_v33, %v1331_v32 }
 0x343   :  { %v1328_v43 = vadd.f32 1.0, %v2583_v12  ;;  %v1334_v34 = vadd.f32 %v2592_v42, %v1330_v36 }
 0x344   :  { %v1333_v45 = vmul.f32 %v1329_v38, %v1317_v37 }
 0x345   :  { %v1332_v46 = vmul.f32 %v1328_v43, %v1316_v39  ;;  %2155 = vmatprep.mubr.f32.mxu0 %v1334_v34 }
 0x346   :  { %2156 = vmatmul.mubr.f32.vlgmr.msra.gmra.mrb[4].mxu0 %v1335_v44  ;;  %v1337_v16 = vadd.f32 %v2595_v50, %v1333_v45 }
 0x347   :  { %v1336_v49 = vadd.f32 %v2594_v47, %v1332_v46 }
 0x349   :  { %2158 = vmatprep.mubr.f32.mxu1 %v1336_v49 }
 0x34a   :  { %2159 = vmatmul.mubr.f32.vlgmr.msra.gmra.mrb[4].mxu1 %v1337_v16 }
 0x419   :  { %v2157_v35 = vpop.f32.mrb[4].mxu0 }
 0x41a   :  { %v1430_v13 = vadd.f32 %v2157_v35, %v1520_v51  ;;  %v1424_v52 = vpop.f32.mrb[5].mxu0 }
 0x41b   :  { %v1425_v53 = vadd.f32 %v1520_v51, %v1424_v52 }
 0x41c   :  { %v1448_v54 = vmul.f32 0.70710677, %v1430_v13  ;;  %v1444_v1 = vmul.f32 0.5, %v1430_v13 }
 0x41d   :  { %v1447_v55 = vmul.f32 0.70710677, %v1425_v53  ;;  %v2160_v56 = vpop.f32.mrb[4].mxu1  ;;  %v1443_v3 = vmul.f32 0.5, %v1425_v53 }
 0x41e   :  { %2584 = verf.f32 %v1448_v54  ;;  %v1440_v40 = vadd.f32 %v2160_v56, %v1520_v51  ;;  %v1434_v41 = vpop.f32.mrb[5].mxu1 }
 0x41f   :  { %2586 = verf.f32 %v1447_v55  ;;  %v1435_v57 = vadd.f32 %v1520_v51, %v1434_v41 }
 0x420   :  { %v1450_v58 = vmul.f32 0.70710677, %v1440_v40  ;;  %v1446_v7 = vmul.f32 0.5, %v1440_v40 }
 0x421   :  { %v1449_v59 = vmul.f32 0.70710677, %v1435_v57  ;;  %v1445_v11 = vmul.f32 0.5, %v1435_v57 }
 0x422   :  { %2588 = verf.f32 %v1450_v58 }
 0x423   :  { %2590 = verf.f32 %v1449_v59 }
 0x428   :  { %v2585_v60 = vpop.eup %2584 }
 0x429   :  { %v2587_v10 = vpop.eup %2586  ;;  %v1456_v61 = vadd.f32 1.0, %v2585_v60 }
 0x42a   :  { %v1455_v62 = vadd.f32 1.0, %v2587_v10 }
 0x42b   :  { %v1460_v63 = vmul.f32 %v1456_v61, %v1444_v1 }
 0x42c   :  { %v2589_v0 = vpop.eup %2588  ;;  %v1459_v4 = vmul.f32 %v1455_v62, %v1443_v3 }
 0x42d   :  { %v2591_v5 = vpop.eup %2590  ;;  %v1468_v6 = vmul.f32 %v1521_v48, %v1460_v63  ;;  %v1458_v8 = vadd.f32 1.0, %v2589_v0 }
 0x42e   :  { %v1467_v9 = vmul.f32 %v1521_v48, %v1459_v4  ;;  %v1457_v14 = vadd.f32 1.0, %v2591_v5 }
 0x42f   :  { %v1476_v15 = vadd.f32 %v1522_v2, %v1468_v6  ;;  %v1462_v17 = vmul.f32 %v1458_v8, %v1446_v7 }
 0x430   :  { %v1475_v18 = vadd.f32 %v1522_v2, %v1467_v9  ;;  %v1461_v19 = vmul.f32 %v1457_v14, %v1445_v11 }
 0x431   :  { %1480 = vst [vmem:[#allocation10 + $0x8] sm:$0xff] %v1476_v15  ;;  %v1470_v20 = vmul.f32 %v1521_v48, %v1462_v17 }
 0x432   :  { %1479 = vst [vmem:[#allocation10] sm:$0xff] %v1475_v18  ;;  %v1469_v21 = vmul.f32 %v1521_v48, %v1461_v19 }
 0x433   :  { %v1478_v22 = vadd.f32 %v1522_v2, %v1470_v20 }
 0x434   :  { %v1477_v23 = vadd.f32 %v1522_v2, %v1469_v21 }
 0x435   :  { %1482 = vst [vmem:[#allocation10 + $0x18] sm:$0xff] %v1478_v22 }
 0x436   :  { %1481 = vst [vmem:[#allocation10 + $0x10] sm:$0xff] %v1477_v23 }
 0x437   :  { %2695 = shalt.err (!%p2692_p8)
}
 0x438   :  { %s2696_s0 = scalar_lea.hbm %s3057_s5, 512 }
 0x439   :  { %p2697_p9 = scmp.ne.s32.totalorder %s3057_s5, %s2696_s0  ;;  %p2700_p10 = scmp.lt.u32.totalorder %s2696_s0, %s3057_s5 }
 0x43b   :  { %p2702_p11 = pnand %p2700_p10, %p2697_p9 }
 0x43d   :  { %2705 = shalt.err (!%p2702_p11)
}
 0x43e   :  { %1494 = dma.vmem_to_hbm [thread:$0]  %s1489_s27, 512, %s3057_s5, [#allocation4], %s2716_s30, %s2716_s30, %s2717_s6  }
 0x43f   :  { %2712 = dma.done.wait [#allocation4], 512  }
 0x440   :  { %2713 = vsyncadd [#allocation4], 4294966784 }
 0x441   :  { %1498 = vsyncpa [#allocation3], 1 }
 0x442   :  { %1499 = vsyncpa [#allocation6], 1 }
 0x443   :  { %1500 = vsyncpa [#allocation9], 1 }
 0x444   :  { %1501 = vsyncpa [#allocation4], 1 }

</bundles_post_ra>
